<compile_context>
chip_gen: v6e
topology: v6e:2x2x1
jax: 0.10.0
libtpu: 0.0.40
codegen_flags: <defaults>
</compile_context>

<pallas_src>
import jax
import jax.numpy as jnp
from jax import lax
from jax.experimental import pallas as pl
from jax.experimental.pallas import tpu as pltpu


def _round_up(n, m):
    return (n + m - 1) // m * m


# --------------------------- fused RNN + FC kernel ---------------------------
def _build_kernel(num_layers, chunk_len, b_pad):
    """kernel(x2d, (w_ih, w_hh, b)*L, fc_w, fc_b, out, buf0, buf1, h_all)."""
    unroll_python = chunk_len <= 16

    def kernel(*refs):
        x_ref = refs[0]
        layer_refs = [tuple(refs[1 + 3 * l: 4 + 3 * l]) for l in range(num_layers)]
        fc_w_ref = refs[1 + 3 * num_layers]
        fc_b_ref = refs[2 + 3 * num_layers]
        out_ref = refs[3 + 3 * num_layers]
        buf0 = refs[4 + 3 * num_layers]      # (chunk_rows, Hp) ping
        buf1 = refs[5 + 3 * num_layers]      # (chunk_rows, Hp) pong
        h_all = refs[6 + 3 * num_layers]     # (L*b_pad, Hp) per-layer carried hidden

        chunk = pl.program_id(0)

        @pl.when(chunk == 0)
        def _init():
            h_all[...] = jnp.zeros_like(h_all)

        bufs = (buf0, buf1)
        src_ref = x_ref
        for l in range(num_layers):
            w_ih_ref, w_hh_ref, b_ref = layer_refs[l]
            dst_ref = bufs[l % 2]            # ping-pong: src != dst, no RAW aliasing

            # Hoisted, time-independent input projection for the whole chunk: one
            # MXU matmul with the combined bias folded in.
            dst_ref[...] = (
                jnp.dot(src_ref[...], w_ih_ref[...],
                        preferred_element_type=jnp.float32)
                + b_ref[...])

            # Keep W_hh resident in vregs and the hidden state as a loop carry
            # (one (8,128) f32 vreg) -- no per-step VMEM round trip for h.
            w_hh = w_hh_ref[...]
            h = h_all[pl.ds(l * b_pad, b_pad), :]

            def step(t, h):
                row = t * b_pad
                if not isinstance(row, int):
                    row = pl.multiple_of(row, b_pad)      # tile-aligned dynamic start
                pre = dst_ref[pl.ds(row, b_pad), :]
                h_new = jnp.maximum(
                    pre + jnp.dot(h, w_hh, preferred_element_type=jnp.float32),
                    0.0)
                # Overwrite the pre-activation slot in place -> this layer's output
                # sequence (off the critical path; next layer reads it).
                dst_ref[pl.ds(row, b_pad), :] = h_new
                return h_new

            if unroll_python:
                for t in range(chunk_len):
                    h = step(t, h)
            else:
                h = lax.fori_loop(0, chunk_len, step, h, unroll=8)

            h_all[pl.ds(l * b_pad, b_pad), :] = h         # once per chunk, not per step
            src_ref = dst_ref

        # FC head, emitted at the REAL output width O (no 128x write amplification).
        out_ref[...] = (
            jnp.dot(src_ref[...], fc_w_ref[...],
                    preferred_element_type=jnp.float32)
            + fc_b_ref[...]).astype(out_ref.dtype)

    return kernel


def _fused_forward_pallas(x2d, layers, fc_w, fc_b, *, chunk_len, num_chunks,
                          b_pad, hp, cost):
    num_layers = len(layers)
    chunk_rows = chunk_len * b_pad
    n_rows = num_chunks * chunk_rows
    d_in = x2d.shape[1]
    o_dim = fc_w.shape[1]

    kernel = _build_kernel(num_layers, chunk_len, b_pad)

    in_specs = [pl.BlockSpec((chunk_rows, d_in), lambda c: (c, 0))]
    operands = [x2d]
    for (w_ih, w_hh, b) in layers:
        in_specs += [pl.BlockSpec(w_ih.shape, lambda c: (0, 0)),
                     pl.BlockSpec(w_hh.shape, lambda c: (0, 0)),
                     pl.BlockSpec(b.shape, lambda c: (0, 0))]
        operands += [w_ih, w_hh, b]
    in_specs += [pl.BlockSpec(fc_w.shape, lambda c: (0, 0)),
                 pl.BlockSpec(fc_b.shape, lambda c: (0, 0))]
    operands += [fc_w, fc_b]

    out_specs = pl.BlockSpec((chunk_rows, o_dim), lambda c: (c, 0))

    # Explicit VMEM budget (scratch + double-buffered blocks + weights), with margin,
    # capped at 32 MiB -- safe on v5e/v6e/v7x.
    scratch_bytes = 4 * (2 * chunk_rows * hp + num_layers * b_pad * hp)
    weight_bytes = 4 * (sum(w.size for trip in layers for w in trip)
                        + fc_w.size + fc_b.size)
    io_bytes = 4 * 2 * chunk_rows * (d_in + o_dim)        # double-buffered in/out
    vmem_limit = int(min(max(2 * (scratch_bytes + weight_bytes + io_bytes) + (4 << 20),
                             16 << 20), 32 << 20))

    grid_spec = pltpu.PrefetchScalarGridSpec(
        num_scalar_prefetch=0,
        grid=(num_chunks,),
        in_specs=in_specs,
        out_specs=out_specs,
        scratch_shapes=[
            pltpu.VMEM((chunk_rows, hp), jnp.float32),          # ping
            pltpu.VMEM((chunk_rows, hp), jnp.float32),          # pong
            pltpu.VMEM((num_layers * b_pad, hp), jnp.float32),  # carried hidden
        ],
    )

    # TODO(synk): add a parallel batch grid axis when B_pad >= 16 to occupy v7x's
    # second TensorCore (no-op on v5e/v6e single-TC chips).
    return pl.pallas_call(
        kernel,
        out_shape=jax.ShapeDtypeStruct((n_rows, o_dim), jnp.float32),
        grid_spec=grid_spec,
        compiler_params=pltpu.CompilerParams(
            dimension_semantics=("arbitrary",),     # chunk axis carries hidden state
            vmem_limit_bytes=vmem_limit),
        cost_estimate=cost,
    )(*operands)


# ------------------------------ parameter padding ----------------------------
def _pad_params(params, hp):
    """Zero-pad H -> hp lanes (exact: padded hidden units stay 0). O is NOT padded."""
    h = params["layers"][0]["w_hh"].shape[0]
    layers = []
    for l, layer in enumerate(params["layers"]):
        w_ih, w_hh, b = layer["w_ih"], layer["w_hh"], layer["b"]
        rows = w_ih.shape[0] if l == 0 else hp   # layer 0 keeps the raw input width
        w_ih_p = jnp.zeros((rows, hp), jnp.float32).at[:w_ih.shape[0], :h].set(w_ih)
        w_hh_p = jnp.zeros((hp, hp), jnp.float32).at[:h, :h].set(w_hh)
        b_p = jnp.zeros((1, hp), jnp.float32).at[:, :h].set(b)
        layers.append((w_ih_p, w_hh_p, b_p))
    o = params["fc_w"].shape[1]
    fc_w_p = jnp.zeros((hp, o), jnp.float32).at[:h, :].set(params["fc_w"])
    fc_b_p = params["fc_b"].astype(jnp.float32)
    return layers, fc_w_p, fc_b_p


# ------------------------------- model wrapper --------------------------------
def init_params(key, input_dim, hidden_dim, layer_dim, output_dim):
    """Deterministic init mimicking PyTorch's U(-1/sqrt(H), 1/sqrt(H))."""
    params = {"layers": []}
    bound = 1.0 / jnp.sqrt(jnp.float32(hidden_dim))
    for l in range(layer_dim):
        d_in = input_dim if l == 0 else hidden_dim
        key, k1, k2, k3, k4 = jax.random.split(key, 5)
        w_ih = jax.random.uniform(k1, (d_in, hidden_dim), jnp.float32, -bound, bound)
        w_hh = jax.random.uniform(k2, (hidden_dim, hidden_dim), jnp.float32, -bound, bound)
        b_ih = jax.random.uniform(k3, (1, hidden_dim), jnp.float32, -bound, bound)
        b_hh = jax.random.uniform(k4, (1, hidden_dim), jnp.float32, -bound, bound)
        params["layers"].append({"w_ih": w_ih, "w_hh": w_hh, "b": b_ih + b_hh})
    key, k1, k2 = jax.random.split(key, 3)
    params["fc_w"] = jax.random.uniform(k1, (hidden_dim, output_dim), jnp.float32, -bound, bound)
    params["fc_b"] = jax.random.uniform(k2, (1, output_dim), jnp.float32, -bound, bound)
    return params


@jax.jit
def rnn_model_forward(params, x):
    """x: (B, T, input_dim) -> fc(rnn(x)).squeeze(), matching the PyTorch module."""
    B, T, D = x.shape
    H = params["layers"][0]["w_hh"].shape[0]
    O = params["fc_w"].shape[1]
    L = len(params["layers"])

    B_pad = _round_up(B, 8)                                   # sublane multiple
    Hp = _round_up(H, 256) if H > 128 else _round_up(H, 128)  # lane / MXU-width multiple

    # T-chunking: bound the per-chunk activation scratch (2 ping-pong buffers) to
    # ~4 MiB independent of T; hidden state carries across chunks in VMEM scratch.
    max_chunk = max(1, min(T, (4 << 20) // (2 * B_pad * Hp * 4)))
    num_chunks = pl.cdiv(T, max_chunk)
    chunk_len = pl.cdiv(T, num_chunks)
    T_pad = chunk_len * num_chunks

    # Only the tiny raw input is transposed/padded on the XLA side; activations stay
    # time-major and VMEM-resident inside the fused kernel.
    x_tm = jnp.transpose(x.astype(jnp.float32), (1, 0, 2))            # (T, B, D)
    x_tm = jnp.pad(x_tm, ((0, T_pad - T), (0, B_pad - B), (0, 0)))    # (T_pad, B_pad, D)
    x2d = x_tm.reshape(T_pad * B_pad, D)                              # time-major rows

    layers, fc_w, fc_b = _pad_params(params, Hp)

    # Cost estimate on REAL (unpadded) dims -- advisory for XLA scheduling.
    flops = (2 * T * B * D * H                        # layer-0 projection
             + (L - 1) * 2 * T * B * H * H            # deeper-layer projections
             + L * 2 * T * B * H * H                  # recurrent matmuls
             + 2 * T * B * H * O)                     # FC head
    bytes_accessed = 4 * (B * T * D
                          + sum(l["w_ih"].size + l["w_hh"].size + l["b"].size
                                for l in params["layers"])
                          + params["fc_w"].size + params["fc_b"].size
                          + T * B * O)
    cost = pl.CostEstimate(flops=flops, transcendentals=0,
                           bytes_accessed=bytes_accessed)

    out2d = _fused_forward_pallas(x2d, layers, fc_w, fc_b,
                                  chunk_len=chunk_len, num_chunks=num_chunks,
                                  b_pad=B_pad, hp=Hp, cost=cost)

    y = out2d.reshape(T_pad, B_pad, O)[:T, :B, :]     # drop time/batch padding
    y = jnp.transpose(y, (1, 0, 2))                   # (B, T, O) batch-first
    return jnp.squeeze(y)                             # torch .squeeze()


# ----------------------------- pure-JAX reference -----------------------------
def _reference_forward(params, x):
    """Straightforward JAX port of the PyTorch module (correctness check)."""
    B, T, _ = x.shape
    h_seq = jnp.transpose(x.astype(jnp.float32), (1, 0, 2))     # (T, B, D)
    for layer in params["layers"]:
        w_ih, w_hh, b = layer["w_ih"], layer["w_hh"], layer["b"]
        h = jnp.zeros((B, w_hh.shape[0]), jnp.float32)
        outs = []
        for t in range(T):
            h = jnp.maximum(h_seq[t] @ w_ih + h @ w_hh + b, 0.0)
            outs.append(h)
        h_seq = jnp.stack(outs, axis=0)
    out = jnp.transpose(h_seq, (1, 0, 2))                       # (B, T, H)
    y = out @ params["fc_w"] + params["fc_b"]
    return jnp.squeeze(y)


if __name__ == "__main__":
    # Small shapes consistent with the module's forward.
    batch, seq = 2, 8
    input_dim, hidden_dim, layer_dim, output_dim = 4, 32, 2, 1

    key = jax.random.PRNGKey(0)
    key, kx, kp = jax.random.split(key, 3)
    x = jax.random.normal(kx, (batch, seq, input_dim), jnp.float32)
    params = init_params(kp, input_dim, hidden_dim, layer_dim, output_dim)

    out = rnn_model_forward(params, x)
    jax.block_until_ready(out)
    assert out.shape == (batch, seq), out.shape

    ref = _reference_forward(params, x)
    err = float(jnp.max(jnp.abs(out - ref)))
    assert err < 1e-3, f"max |kernel - reference| = {err}"
    print("KERNEL_OK")
</pallas_src>

<mosaic_0001>
module attributes {stable_mosaic.version = 11 : i64} {
  func.func @kernel(%arg0: i32, %arg1: memref<64x4xf32, #tpu.memory_space<vmem>>, %arg2: memref<4x128xf32, #tpu.memory_space<vmem>>, %arg3: memref<128x128xf32, #tpu.memory_space<vmem>>, %arg4: memref<1x128xf32, #tpu.memory_space<vmem>>, %arg5: memref<128x128xf32, #tpu.memory_space<vmem>>, %arg6: memref<128x128xf32, #tpu.memory_space<vmem>>, %arg7: memref<1x128xf32, #tpu.memory_space<vmem>>, %arg8: memref<128x1xf32, #tpu.memory_space<vmem>>, %arg9: memref<1x1xf32, #tpu.memory_space<vmem>>, %arg10: memref<64x1xf32, #tpu.memory_space<vmem>>, %arg11: memref<64x128xf32, #tpu.memory_space<vmem>>, %arg12: memref<64x128xf32, #tpu.memory_space<vmem>>, %arg13: memref<16x128xf32, #tpu.memory_space<vmem>>) attributes {dimension_semantics = [#tpu.dimension_semantics<arbitrary>], iteration_bounds = array<i64: 1>, scalar_prefetch = 0 : i64, scratch_operands = 3 : i64, tpu.core_type = #tpu.core_type<tc>, window_params = [{transform_indices = @transform_0, window_bounds = array<i64: 64, 4>}, {pipeline_mode = #tpu.pipeline_mode<synchronous>, transform_indices = @transform_1, window_bounds = array<i64: 4, 128>}, {pipeline_mode = #tpu.pipeline_mode<synchronous>, transform_indices = @transform_2, window_bounds = array<i64: 128, 128>}, {pipeline_mode = #tpu.pipeline_mode<synchronous>, transform_indices = @transform_3, window_bounds = array<i64: 1, 128>}, {pipeline_mode = #tpu.pipeline_mode<synchronous>, transform_indices = @transform_4, window_bounds = array<i64: 128, 128>}, {pipeline_mode = #tpu.pipeline_mode<synchronous>, transform_indices = @transform_5, window_bounds = array<i64: 128, 128>}, {pipeline_mode = #tpu.pipeline_mode<synchronous>, transform_indices = @transform_6, window_bounds = array<i64: 1, 128>}, {pipeline_mode = #tpu.pipeline_mode<synchronous>, transform_indices = @transform_7, window_bounds = array<i64: 128, 1>}, {pipeline_mode = #tpu.pipeline_mode<synchronous>, transform_indices = @transform_8, window_bounds = array<i64: 1, 1>}, {transform_indices = @transform_9, window_bounds = array<i64: 64, 1>}]} {
    %c0_i32 = arith.constant 0 : i32
    %0 = arith.cmpi eq, %arg0, %c0_i32 : i32
    %1 = arith.extui %0 : i1 to i32
    %c0_i32_0 = arith.constant 0 : i32
    %2 = arith.cmpi ne, %1, %c0_i32_0 : i32
    scf.if %2 {
      %cst_127 = arith.constant 0.000000e+00 : f32
      %126 = vector.broadcast %cst_127 : f32 to vector<16x128xf32>
      %c0_128 = arith.constant 0 : index
      %c0_129 = arith.constant 0 : index
      %127 = vector.load %arg13[%c0_128, %c0_129] : memref<16x128xf32, #tpu.memory_space<vmem>>, vector<16x128xf32>
      tpu.vector_store %arg13[%c0_128, %c0_129], %126 {strides = array<i32>} : memref<16x128xf32, #tpu.memory_space<vmem>>, vector<16x128xf32>,
    } else {
    }
    %c0 = arith.constant 0 : index
    %c0_1 = arith.constant 0 : index
    %3 = vector.load %arg1[%c0, %c0_1] : memref<64x4xf32, #tpu.memory_space<vmem>>, vector<64x4xf32>
    %c0_2 = arith.constant 0 : index
    %c0_3 = arith.constant 0 : index
    %4 = vector.load %arg2[%c0_2, %c0_3] : memref<4x128xf32, #tpu.memory_space<vmem>>, vector<4x128xf32>
    %cst = arith.constant dense<0.000000e+00> : vector<64x128xf32>
    %5 = tpu.matmul %3, %4, %cst {dimension_numbers = #tpu.dot_dimension_numbers<[1], [0], [0], [1], [0, 0, 1, 1], [], []>} : vector<64x4xf32>, vector<4x128xf32>, vector<64x128xf32> -> vector<64x128xf32>
    %c0_4 = arith.constant 0 : index
    %c0_5 = arith.constant 0 : index
    %6 = vector.load %arg4[%c0_4, %c0_5] : memref<1x128xf32, #tpu.memory_space<vmem>>, vector<1x128xf32>
    %7 = vector.broadcast %6 : vector<1x128xf32> to vector<64x128xf32>
    %8 = arith.addf %5, %7 : vector<64x128xf32>
    %c0_6 = arith.constant 0 : index
    %c0_7 = arith.constant 0 : index
    %9 = vector.load %arg11[%c0_6, %c0_7] : memref<64x128xf32, #tpu.memory_space<vmem>>, vector<64x128xf32>
    tpu.vector_store %arg11[%c0_6, %c0_7], %8 {strides = array<i32>} : memref<64x128xf32, #tpu.memory_space<vmem>>, vector<64x128xf32>,
    %c0_8 = arith.constant 0 : index
    %c0_9 = arith.constant 0 : index
    %10 = vector.load %arg3[%c0_8, %c0_9] : memref<128x128xf32, #tpu.memory_space<vmem>>, vector<128x128xf32>
    %c0_10 = arith.constant 0 : index
    %c0_11 = arith.constant 0 : index
    %11 = vector.load %arg13[%c0_10, %c0_11] : memref<16x128xf32, #tpu.memory_space<vmem>>, vector<8x128xf32>
    %c0_12 = arith.constant 0 : index
    %c0_13 = arith.constant 0 : index
    %12 = vector.load %arg11[%c0_12, %c0_13] : memref<64x128xf32, #tpu.memory_space<vmem>>, vector<8x128xf32>
    %cst_14 = arith.constant dense<0.000000e+00> : vector<8x128xf32>
    %13 = tpu.matmul %11, %10, %cst_14 {dimension_numbers = #tpu.dot_dimension_numbers<[1], [0], [0], [1], [0, 0, 1, 1], [], []>} : vector<8x128xf32>, vector<128x128xf32>, vector<8x128xf32> -> vector<8x128xf32>
    %14 = arith.addf %12, %13 : vector<8x128xf32>
    %cst_15 = arith.constant 0.000000e+00 : f32
    %15 = vector.broadcast %cst_15 : f32 to vector<8x128xf32>
    %16 = arith.maximumf %14, %15 : vector<8x128xf32>
    %c0_16 = arith.constant 0 : index
    %c0_17 = arith.constant 0 : index
    %17 = vector.load %arg11[%c0_16, %c0_17] : memref<64x128xf32, #tpu.memory_space<vmem>>, vector<8x128xf32>
    tpu.vector_store %arg11[%c0_16, %c0_17], %16 {strides = array<i32>} : memref<64x128xf32, #tpu.memory_space<vmem>>, vector<8x128xf32>,
    %c8 = arith.constant 8 : index
    %c0_18 = arith.constant 0 : index
    %18 = vector.load %arg11[%c8, %c0_18] : memref<64x128xf32, #tpu.memory_space<vmem>>, vector<8x128xf32>
    %cst_19 = arith.constant dense<0.000000e+00> : vector<8x128xf32>
    %19 = tpu.matmul %16, %10, %cst_19 {dimension_numbers = #tpu.dot_dimension_numbers<[1], [0], [0], [1], [0, 0, 1, 1], [], []>} : vector<8x128xf32>, vector<128x128xf32>, vector<8x128xf32> -> vector<8x128xf32>
    %20 = arith.addf %18, %19 : vector<8x128xf32>
    %cst_20 = arith.constant 0.000000e+00 : f32
    %21 = vector.broadcast %cst_20 : f32 to vector<8x128xf32>
    %22 = arith.maximumf %20, %21 : vector<8x128xf32>
    %c8_21 = arith.constant 8 : index
    %c0_22 = arith.constant 0 : index
    %23 = vector.load %arg11[%c8_21, %c0_22] : memref<64x128xf32, #tpu.memory_space<vmem>>, vector<8x128xf32>
    tpu.vector_store %arg11[%c8_21, %c0_22], %22 {strides = array<i32>} : memref<64x128xf32, #tpu.memory_space<vmem>>, vector<8x128xf32>,
    %c16 = arith.constant 16 : index
    %c0_23 = arith.constant 0 : index
    %24 = vector.load %arg11[%c16, %c0_23] : memref<64x128xf32, #tpu.memory_space<vmem>>, vector<8x128xf32>
    %cst_24 = arith.constant dense<0.000000e+00> : vector<8x128xf32>
    %25 = tpu.matmul %22, %10, %cst_24 {dimension_numbers = #tpu.dot_dimension_numbers<[1], [0], [0], [1], [0, 0, 1, 1], [], []>} : vector<8x128xf32>, vector<128x128xf32>, vector<8x128xf32> -> vector<8x128xf32>
    %26 = arith.addf %24, %25 : vector<8x128xf32>
    %cst_25 = arith.constant 0.000000e+00 : f32
    %27 = vector.broadcast %cst_25 : f32 to vector<8x128xf32>
    %28 = arith.maximumf %26, %27 : vector<8x128xf32>
    %c16_26 = arith.constant 16 : index
    %c0_27 = arith.constant 0 : index
    %29 = vector.load %arg11[%c16_26, %c0_27] : memref<64x128xf32, #tpu.memory_space<vmem>>, vector<8x128xf32>
    tpu.vector_store %arg11[%c16_26, %c0_27], %28 {strides = array<i32>} : memref<64x128xf32, #tpu.memory_space<vmem>>, vector<8x128xf32>,
    %c24 = arith.constant 24 : index
    %c0_28 = arith.constant 0 : index
    %30 = vector.load %arg11[%c24, %c0_28] : memref<64x128xf32, #tpu.memory_space<vmem>>, vector<8x128xf32>
    %cst_29 = arith.constant dense<0.000000e+00> : vector<8x128xf32>
    %31 = tpu.matmul %28, %10, %cst_29 {dimension_numbers = #tpu.dot_dimension_numbers<[1], [0], [0], [1], [0, 0, 1, 1], [], []>} : vector<8x128xf32>, vector<128x128xf32>, vector<8x128xf32> -> vector<8x128xf32>
    %32 = arith.addf %30, %31 : vector<8x128xf32>
    %cst_30 = arith.constant 0.000000e+00 : f32
    %33 = vector.broadcast %cst_30 : f32 to vector<8x128xf32>
    %34 = arith.maximumf %32, %33 : vector<8x128xf32>
    %c24_31 = arith.constant 24 : index
    %c0_32 = arith.constant 0 : index
    %35 = vector.load %arg11[%c24_31, %c0_32] : memref<64x128xf32, #tpu.memory_space<vmem>>, vector<8x128xf32>
    tpu.vector_store %arg11[%c24_31, %c0_32], %34 {strides = array<i32>} : memref<64x128xf32, #tpu.memory_space<vmem>>, vector<8x128xf32>,
    %c32 = arith.constant 32 : index
    %c0_33 = arith.constant 0 : index
    %36 = vector.load %arg11[%c32, %c0_33] : memref<64x128xf32, #tpu.memory_space<vmem>>, vector<8x128xf32>
    %cst_34 = arith.constant dense<0.000000e+00> : vector<8x128xf32>
    %37 = tpu.matmul %34, %10, %cst_34 {dimension_numbers = #tpu.dot_dimension_numbers<[1], [0], [0], [1], [0, 0, 1, 1], [], []>} : vector<8x128xf32>, vector<128x128xf32>, vector<8x128xf32> -> vector<8x128xf32>
    %38 = arith.addf %36, %37 : vector<8x128xf32>
    %cst_35 = arith.constant 0.000000e+00 : f32
    %39 = vector.broadcast %cst_35 : f32 to vector<8x128xf32>
    %40 = arith.maximumf %38, %39 : vector<8x128xf32>
    %c32_36 = arith.constant 32 : index
    %c0_37 = arith.constant 0 : index
    %41 = vector.load %arg11[%c32_36, %c0_37] : memref<64x128xf32, #tpu.memory_space<vmem>>, vector<8x128xf32>
    tpu.vector_store %arg11[%c32_36, %c0_37], %40 {strides = array<i32>} : memref<64x128xf32, #tpu.memory_space<vmem>>, vector<8x128xf32>,
    %c40 = arith.constant 40 : index
    %c0_38 = arith.constant 0 : index
    %42 = vector.load %arg11[%c40, %c0_38] : memref<64x128xf32, #tpu.memory_space<vmem>>, vector<8x128xf32>
    %cst_39 = arith.constant dense<0.000000e+00> : vector<8x128xf32>
    %43 = tpu.matmul %40, %10, %cst_39 {dimension_numbers = #tpu.dot_dimension_numbers<[1], [0], [0], [1], [0, 0, 1, 1], [], []>} : vector<8x128xf32>, vector<128x128xf32>, vector<8x128xf32> -> vector<8x128xf32>
    %44 = arith.addf %42, %43 : vector<8x128xf32>
    %cst_40 = arith.constant 0.000000e+00 : f32
    %45 = vector.broadcast %cst_40 : f32 to vector<8x128xf32>
    %46 = arith.maximumf %44, %45 : vector<8x128xf32>
    %c40_41 = arith.constant 40 : index
    %c0_42 = arith.constant 0 : index
    %47 = vector.load %arg11[%c40_41, %c0_42] : memref<64x128xf32, #tpu.memory_space<vmem>>, vector<8x128xf32>
    tpu.vector_store %arg11[%c40_41, %c0_42], %46 {strides = array<i32>} : memref<64x128xf32, #tpu.memory_space<vmem>>, vector<8x128xf32>,
    %c48 = arith.constant 48 : index
    %c0_43 = arith.constant 0 : index
    %48 = vector.load %arg11[%c48, %c0_43] : memref<64x128xf32, #tpu.memory_space<vmem>>, vector<8x128xf32>
    %cst_44 = arith.constant dense<0.000000e+00> : vector<8x128xf32>
    %49 = tpu.matmul %46, %10, %cst_44 {dimension_numbers = #tpu.dot_dimension_numbers<[1], [0], [0], [1], [0, 0, 1, 1], [], []>} : vector<8x128xf32>, vector<128x128xf32>, vector<8x128xf32> -> vector<8x128xf32>
    %50 = arith.addf %48, %49 : vector<8x128xf32>
    %cst_45 = arith.constant 0.000000e+00 : f32
    %51 = vector.broadcast %cst_45 : f32 to vector<8x128xf32>
    %52 = arith.maximumf %50, %51 : vector<8x128xf32>
    %c48_46 = arith.constant 48 : index
    %c0_47 = arith.constant 0 : index
    %53 = vector.load %arg11[%c48_46, %c0_47] : memref<64x128xf32, #tpu.memory_space<vmem>>, vector<8x128xf32>
    tpu.vector_store %arg11[%c48_46, %c0_47], %52 {strides = array<i32>} : memref<64x128xf32, #tpu.memory_space<vmem>>, vector<8x128xf32>,
    %c56 = arith.constant 56 : index
    %c0_48 = arith.constant 0 : index
    %54 = vector.load %arg11[%c56, %c0_48] : memref<64x128xf32, #tpu.memory_space<vmem>>, vector<8x128xf32>
    %cst_49 = arith.constant dense<0.000000e+00> : vector<8x128xf32>
    %55 = tpu.matmul %52, %10, %cst_49 {dimension_numbers = #tpu.dot_dimension_numbers<[1], [0], [0], [1], [0, 0, 1, 1], [], []>} : vector<8x128xf32>, vector<128x128xf32>, vector<8x128xf32> -> vector<8x128xf32>
    %56 = arith.addf %54, %55 : vector<8x128xf32>
    %cst_50 = arith.constant 0.000000e+00 : f32
    %57 = vector.broadcast %cst_50 : f32 to vector<8x128xf32>
    %58 = arith.maximumf %56, %57 : vector<8x128xf32>
    %c56_51 = arith.constant 56 : index
    %c0_52 = arith.constant 0 : index
    %59 = vector.load %arg11[%c56_51, %c0_52] : memref<64x128xf32, #tpu.memory_space<vmem>>, vector<8x128xf32>
    tpu.vector_store %arg11[%c56_51, %c0_52], %58 {strides = array<i32>} : memref<64x128xf32, #tpu.memory_space<vmem>>, vector<8x128xf32>,
    %c0_53 = arith.constant 0 : index
    %c0_54 = arith.constant 0 : index
    %60 = vector.load %arg13[%c0_53, %c0_54] : memref<16x128xf32, #tpu.memory_space<vmem>>, vector<8x128xf32>
    tpu.vector_store %arg13[%c0_53, %c0_54], %58 {strides = array<i32>} : memref<16x128xf32, #tpu.memory_space<vmem>>, vector<8x128xf32>,
    %c0_55 = arith.constant 0 : index
    %c0_56 = arith.constant 0 : index
    %61 = vector.load %arg11[%c0_55, %c0_56] : memref<64x128xf32, #tpu.memory_space<vmem>>, vector<64x128xf32>
    %c0_57 = arith.constant 0 : index
    %c0_58 = arith.constant 0 : index
    %62 = vector.load %arg5[%c0_57, %c0_58] : memref<128x128xf32, #tpu.memory_space<vmem>>, vector<128x128xf32>
    %cst_59 = arith.constant dense<0.000000e+00> : vector<64x128xf32>
    %63 = tpu.matmul %61, %62, %cst_59 {dimension_numbers = #tpu.dot_dimension_numbers<[1], [0], [0], [1], [0, 0, 1, 1], [], []>} : vector<64x128xf32>, vector<128x128xf32>, vector<64x128xf32> -> vector<64x128xf32>
    %c0_60 = arith.constant 0 : index
    %c0_61 = arith.constant 0 : index
    %64 = vector.load %arg7[%c0_60, %c0_61] : memref<1x128xf32, #tpu.memory_space<vmem>>, vector<1x128xf32>
    %65 = vector.broadcast %64 : vector<1x128xf32> to vector<64x128xf32>
    %66 = arith.addf %63, %65 : vector<64x128xf32>
    %c0_62 = arith.constant 0 : index
    %c0_63 = arith.constant 0 : index
    %67 = vector.load %arg12[%c0_62, %c0_63] : memref<64x128xf32, #tpu.memory_space<vmem>>, vector<64x128xf32>
    tpu.vector_store %arg12[%c0_62, %c0_63], %66 {strides = array<i32>} : memref<64x128xf32, #tpu.memory_space<vmem>>, vector<64x128xf32>,
    %c0_64 = arith.constant 0 : index
    %c0_65 = arith.constant 0 : index
    %68 = vector.load %arg6[%c0_64, %c0_65] : memref<128x128xf32, #tpu.memory_space<vmem>>, vector<128x128xf32>
    %c8_66 = arith.constant 8 : index
    %c0_67 = arith.constant 0 : index
    %69 = vector.load %arg13[%c8_66, %c0_67] : memref<16x128xf32, #tpu.memory_space<vmem>>, vector<8x128xf32>
    %c0_68 = arith.constant 0 : index
    %c0_69 = arith.constant 0 : index
    %70 = vector.load %arg12[%c0_68, %c0_69] : memref<64x128xf32, #tpu.memory_space<vmem>>, vector<8x128xf32>
    %cst_70 = arith.constant dense<0.000000e+00> : vector<8x128xf32>
    %71 = tpu.matmul %69, %68, %cst_70 {dimension_numbers = #tpu.dot_dimension_numbers<[1], [0], [0], [1], [0, 0, 1, 1], [], []>} : vector<8x128xf32>, vector<128x128xf32>, vector<8x128xf32> -> vector<8x128xf32>
    %72 = arith.addf %70, %71 : vector<8x128xf32>
    %cst_71 = arith.constant 0.000000e+00 : f32
    %73 = vector.broadcast %cst_71 : f32 to vector<8x128xf32>
    %74 = arith.maximumf %72, %73 : vector<8x128xf32>
    %c0_72 = arith.constant 0 : index
    %c0_73 = arith.constant 0 : index
    %75 = vector.load %arg12[%c0_72, %c0_73] : memref<64x128xf32, #tpu.memory_space<vmem>>, vector<8x128xf32>
    tpu.vector_store %arg12[%c0_72, %c0_73], %74 {strides = array<i32>} : memref<64x128xf32, #tpu.memory_space<vmem>>, vector<8x128xf32>,
    %c8_74 = arith.constant 8 : index
    %c0_75 = arith.constant 0 : index
    %76 = vector.load %arg12[%c8_74, %c0_75] : memref<64x128xf32, #tpu.memory_space<vmem>>, vector<8x128xf32>
    %cst_76 = arith.constant dense<0.000000e+00> : vector<8x128xf32>
    %77 = tpu.matmul %74, %68, %cst_76 {dimension_numbers = #tpu.dot_dimension_numbers<[1], [0], [0], [1], [0, 0, 1, 1], [], []>} : vector<8x128xf32>, vector<128x128xf32>, vector<8x128xf32> -> vector<8x128xf32>
    %78 = arith.addf %76, %77 : vector<8x128xf32>
    %cst_77 = arith.constant 0.000000e+00 : f32
    %79 = vector.broadcast %cst_77 : f32 to vector<8x128xf32>
    %80 = arith.maximumf %78, %79 : vector<8x128xf32>
    %c8_78 = arith.constant 8 : index
    %c0_79 = arith.constant 0 : index
    %81 = vector.load %arg12[%c8_78, %c0_79] : memref<64x128xf32, #tpu.memory_space<vmem>>, vector<8x128xf32>
    tpu.vector_store %arg12[%c8_78, %c0_79], %80 {strides = array<i32>} : memref<64x128xf32, #tpu.memory_space<vmem>>, vector<8x128xf32>,
    %c16_80 = arith.constant 16 : index
    %c0_81 = arith.constant 0 : index
    %82 = vector.load %arg12[%c16_80, %c0_81] : memref<64x128xf32, #tpu.memory_space<vmem>>, vector<8x128xf32>
    %cst_82 = arith.constant dense<0.000000e+00> : vector<8x128xf32>
    %83 = tpu.matmul %80, %68, %cst_82 {dimension_numbers = #tpu.dot_dimension_numbers<[1], [0], [0], [1], [0, 0, 1, 1], [], []>} : vector<8x128xf32>, vector<128x128xf32>, vector<8x128xf32> -> vector<8x128xf32>
    %84 = arith.addf %82, %83 : vector<8x128xf32>
    %cst_83 = arith.constant 0.000000e+00 : f32
    %85 = vector.broadcast %cst_83 : f32 to vector<8x128xf32>
    %86 = arith.maximumf %84, %85 : vector<8x128xf32>
    %c16_84 = arith.constant 16 : index
    %c0_85 = arith.constant 0 : index
    %87 = vector.load %arg12[%c16_84, %c0_85] : memref<64x128xf32, #tpu.memory_space<vmem>>, vector<8x128xf32>
    tpu.vector_store %arg12[%c16_84, %c0_85], %86 {strides = array<i32>} : memref<64x128xf32, #tpu.memory_space<vmem>>, vector<8x128xf32>,
    %c24_86 = arith.constant 24 : index
    %c0_87 = arith.constant 0 : index
    %88 = vector.load %arg12[%c24_86, %c0_87] : memref<64x128xf32, #tpu.memory_space<vmem>>, vector<8x128xf32>
    %cst_88 = arith.constant dense<0.000000e+00> : vector<8x128xf32>
    %89 = tpu.matmul %86, %68, %cst_88 {dimension_numbers = #tpu.dot_dimension_numbers<[1], [0], [0], [1], [0, 0, 1, 1], [], []>} : vector<8x128xf32>, vector<128x128xf32>, vector<8x128xf32> -> vector<8x128xf32>
    %90 = arith.addf %88, %89 : vector<8x128xf32>
    %cst_89 = arith.constant 0.000000e+00 : f32
    %91 = vector.broadcast %cst_89 : f32 to vector<8x128xf32>
    %92 = arith.maximumf %90, %91 : vector<8x128xf32>
    %c24_90 = arith.constant 24 : index
    %c0_91 = arith.constant 0 : index
    %93 = vector.load %arg12[%c24_90, %c0_91] : memref<64x128xf32, #tpu.memory_space<vmem>>, vector<8x128xf32>
    tpu.vector_store %arg12[%c24_90, %c0_91], %92 {strides = array<i32>} : memref<64x128xf32, #tpu.memory_space<vmem>>, vector<8x128xf32>,
    %c32_92 = arith.constant 32 : index
    %c0_93 = arith.constant 0 : index
    %94 = vector.load %arg12[%c32_92, %c0_93] : memref<64x128xf32, #tpu.memory_space<vmem>>, vector<8x128xf32>
    %cst_94 = arith.constant dense<0.000000e+00> : vector<8x128xf32>
    %95 = tpu.matmul %92, %68, %cst_94 {dimension_numbers = #tpu.dot_dimension_numbers<[1], [0], [0], [1], [0, 0, 1, 1], [], []>} : vector<8x128xf32>, vector<128x128xf32>, vector<8x128xf32> -> vector<8x128xf32>
    %96 = arith.addf %94, %95 : vector<8x128xf32>
    %cst_95 = arith.constant 0.000000e+00 : f32
    %97 = vector.broadcast %cst_95 : f32 to vector<8x128xf32>
    %98 = arith.maximumf %96, %97 : vector<8x128xf32>
    %c32_96 = arith.constant 32 : index
    %c0_97 = arith.constant 0 : index
    %99 = vector.load %arg12[%c32_96, %c0_97] : memref<64x128xf32, #tpu.memory_space<vmem>>, vector<8x128xf32>
    tpu.vector_store %arg12[%c32_96, %c0_97], %98 {strides = array<i32>} : memref<64x128xf32, #tpu.memory_space<vmem>>, vector<8x128xf32>,
    %c40_98 = arith.constant 40 : index
    %c0_99 = arith.constant 0 : index
    %100 = vector.load %arg12[%c40_98, %c0_99] : memref<64x128xf32, #tpu.memory_space<vmem>>, vector<8x128xf32>
    %cst_100 = arith.constant dense<0.000000e+00> : vector<8x128xf32>
    %101 = tpu.matmul %98, %68, %cst_100 {dimension_numbers = #tpu.dot_dimension_numbers<[1], [0], [0], [1], [0, 0, 1, 1], [], []>} : vector<8x128xf32>, vector<128x128xf32>, vector<8x128xf32> -> vector<8x128xf32>
    %102 = arith.addf %100, %101 : vector<8x128xf32>
    %cst_101 = arith.constant 0.000000e+00 : f32
    %103 = vector.broadcast %cst_101 : f32 to vector<8x128xf32>
    %104 = arith.maximumf %102, %103 : vector<8x128xf32>
    %c40_102 = arith.constant 40 : index
    %c0_103 = arith.constant 0 : index
    %105 = vector.load %arg12[%c40_102, %c0_103] : memref<64x128xf32, #tpu.memory_space<vmem>>, vector<8x128xf32>
    tpu.vector_store %arg12[%c40_102, %c0_103], %104 {strides = array<i32>} : memref<64x128xf32, #tpu.memory_space<vmem>>, vector<8x128xf32>,
    %c48_104 = arith.constant 48 : index
    %c0_105 = arith.constant 0 : index
    %106 = vector.load %arg12[%c48_104, %c0_105] : memref<64x128xf32, #tpu.memory_space<vmem>>, vector<8x128xf32>
    %cst_106 = arith.constant dense<0.000000e+00> : vector<8x128xf32>
    %107 = tpu.matmul %104, %68, %cst_106 {dimension_numbers = #tpu.dot_dimension_numbers<[1], [0], [0], [1], [0, 0, 1, 1], [], []>} : vector<8x128xf32>, vector<128x128xf32>, vector<8x128xf32> -> vector<8x128xf32>
    %108 = arith.addf %106, %107 : vector<8x128xf32>
    %cst_107 = arith.constant 0.000000e+00 : f32
    %109 = vector.broadcast %cst_107 : f32 to vector<8x128xf32>
    %110 = arith.maximumf %108, %109 : vector<8x128xf32>
    %c48_108 = arith.constant 48 : index
    %c0_109 = arith.constant 0 : index
    %111 = vector.load %arg12[%c48_108, %c0_109] : memref<64x128xf32, #tpu.memory_space<vmem>>, vector<8x128xf32>
    tpu.vector_store %arg12[%c48_108, %c0_109], %110 {strides = array<i32>} : memref<64x128xf32, #tpu.memory_space<vmem>>, vector<8x128xf32>,
    %c56_110 = arith.constant 56 : index
    %c0_111 = arith.constant 0 : index
    %112 = vector.load %arg12[%c56_110, %c0_111] : memref<64x128xf32, #tpu.memory_space<vmem>>, vector<8x128xf32>
    %cst_112 = arith.constant dense<0.000000e+00> : vector<8x128xf32>
    %113 = tpu.matmul %110, %68, %cst_112 {dimension_numbers = #tpu.dot_dimension_numbers<[1], [0], [0], [1], [0, 0, 1, 1], [], []>} : vector<8x128xf32>, vector<128x128xf32>, vector<8x128xf32> -> vector<8x128xf32>
    %114 = arith.addf %112, %113 : vector<8x128xf32>
    %cst_113 = arith.constant 0.000000e+00 : f32
    %115 = vector.broadcast %cst_113 : f32 to vector<8x128xf32>
    %116 = arith.maximumf %114, %115 : vector<8x128xf32>
    %c56_114 = arith.constant 56 : index
    %c0_115 = arith.constant 0 : index
    %117 = vector.load %arg12[%c56_114, %c0_115] : memref<64x128xf32, #tpu.memory_space<vmem>>, vector<8x128xf32>
    tpu.vector_store %arg12[%c56_114, %c0_115], %116 {strides = array<i32>} : memref<64x128xf32, #tpu.memory_space<vmem>>, vector<8x128xf32>,
    %c8_116 = arith.constant 8 : index
    %c0_117 = arith.constant 0 : index
    %118 = vector.load %arg13[%c8_116, %c0_117] : memref<16x128xf32, #tpu.memory_space<vmem>>, vector<8x128xf32>
    tpu.vector_store %arg13[%c8_116, %c0_117], %116 {strides = array<i32>} : memref<16x128xf32, #tpu.memory_space<vmem>>, vector<8x128xf32>,
    %c0_118 = arith.constant 0 : index
    %c0_119 = arith.constant 0 : index
    %119 = vector.load %arg12[%c0_118, %c0_119] : memref<64x128xf32, #tpu.memory_space<vmem>>, vector<64x128xf32>
    %c0_120 = arith.constant 0 : index
    %c0_121 = arith.constant 0 : index
    %120 = vector.load %arg8[%c0_120, %c0_121] : memref<128x1xf32, #tpu.memory_space<vmem>>, vector<128x1xf32>
    %cst_122 = arith.constant dense<0.000000e+00> : vector<64x1xf32>
    %121 = tpu.matmul %119, %120, %cst_122 {dimension_numbers = #tpu.dot_dimension_numbers<[1], [0], [0], [1], [0, 0, 1, 1], [], []>} : vector<64x128xf32>, vector<128x1xf32>, vector<64x1xf32> -> vector<64x1xf32>
    %c0_123 = arith.constant 0 : index
    %c0_124 = arith.constant 0 : index
    %122 = vector.load %arg9[%c0_123, %c0_124] : memref<1x1xf32, #tpu.memory_space<vmem>>, vector<1x1xf32>
    %123 = vector.broadcast %122 : vector<1x1xf32> to vector<64x1xf32>
    %124 = arith.addf %121, %123 : vector<64x1xf32>
    %c0_125 = arith.constant 0 : index
    %c0_126 = arith.constant 0 : index
    %125 = vector.load %arg10[%c0_125, %c0_126] : memref<64x1xf32, #tpu.memory_space<vmem>>, vector<64x1xf32>
    tpu.vector_store %arg10[%c0_125, %c0_126], %124 {strides = array<i32>} : memref<64x1xf32, #tpu.memory_space<vmem>>, vector<64x1xf32>,
    return
  }
  func.func @transform_0(%arg0: i32) -> (i32, i32) {
    %c0_i32 = arith.constant 0 : i32
    %c0_i32_0 = arith.constant 0 : i32
    return %arg0, %c0_i32 : i32, i32
  }
  func.func @transform_1(%arg0: i32) -> (i32, i32) {
    %c0_i32 = arith.constant 0 : i32
    %c0_i32_0 = arith.constant 0 : i32
    %c0_i32_1 = arith.constant 0 : i32
    return %c0_i32, %c0_i32_0 : i32, i32
  }
  func.func @transform_2(%arg0: i32) -> (i32, i32) {
    %c0_i32 = arith.constant 0 : i32
    %c0_i32_0 = arith.constant 0 : i32
    %c0_i32_1 = arith.constant 0 : i32
    return %c0_i32, %c0_i32_0 : i32, i32
  }
  func.func @transform_3(%arg0: i32) -> (i32, i32) {
    %c0_i32 = arith.constant 0 : i32
    %c0_i32_0 = arith.constant 0 : i32
    %c0_i32_1 = arith.constant 0 : i32
    return %c0_i32, %c0_i32_0 : i32, i32
  }
  func.func @transform_4(%arg0: i32) -> (i32, i32) {
    %c0_i32 = arith.constant 0 : i32
    %c0_i32_0 = arith.constant 0 : i32
    %c0_i32_1 = arith.constant 0 : i32
    return %c0_i32, %c0_i32_0 : i32, i32
  }
  func.func @transform_5(%arg0: i32) -> (i32, i32) {
    %c0_i32 = arith.constant 0 : i32
    %c0_i32_0 = arith.constant 0 : i32
    %c0_i32_1 = arith.constant 0 : i32
    return %c0_i32, %c0_i32_0 : i32, i32
  }
  func.func @transform_6(%arg0: i32) -> (i32, i32) {
    %c0_i32 = arith.constant 0 : i32
    %c0_i32_0 = arith.constant 0 : i32
    %c0_i32_1 = arith.constant 0 : i32
    return %c0_i32, %c0_i32_0 : i32, i32
  }
  func.func @transform_7(%arg0: i32) -> (i32, i32) {
    %c0_i32 = arith.constant 0 : i32
    %c0_i32_0 = arith.constant 0 : i32
    %c0_i32_1 = arith.constant 0 : i32
    return %c0_i32, %c0_i32_0 : i32, i32
  }
  func.func @transform_8(%arg0: i32) -> (i32, i32) {
    %c0_i32 = arith.constant 0 : i32
    %c0_i32_0 = arith.constant 0 : i32
    %c0_i32_1 = arith.constant 0 : i32
    return %c0_i32, %c0_i32_0 : i32, i32
  }
  func.func @transform_9(%arg0: i32) -> (i32, i32) {
    %c0_i32 = arith.constant 0 : i32
    %c0_i32_0 = arith.constant 0 : i32
    return %arg0, %c0_i32 : i32, i32
  }
}

</mosaic_0001>

<bundles_post_ra>
// kernel: rnn_model_forward.1
= control target key start
LH: loop header
LB: loop body
LE: loop exit
PB: predicated region body
PF: predicated region fallthrough
CT: control target
= control target key end

     0   :  { %vm81_vm0 = vcmask 1043456   ;;  %vm56_vm1 = vcmask 31744   ;;  %v2716_v3 = vmov 0.0   ;;  %vm2717_vm2 = vmmov 0   ;;  %s3759_s1 = inlined_call_operand.vmem [shape: f32[4,128], index: 1, kind: input, shape index: {}]   ;;  %s3760_s0 = inlined_call_operand.vmem [shape: f32[64,4], index: 0, kind: input, shape index: {}]   ;;  %s3761_s2 = inlined_call_operand.vmem [shape: f32[128,128], index: 2, kind: input, shape index: {}]   ;;  %s3762_s3 = inlined_call_operand.vmem [shape: f32[1,128], index: 3, kind: input, shape index: {}]   ;;  %s3763_s4 = inlined_call_operand.vmem [shape: f32[128,128], index: 4, kind: input, shape index: {}]   ;;  %s3764_s5 = inlined_call_operand.vmem [shape: f32[128,128], index: 5, kind: input, shape index: {}]   ;;  %s3765_s6 = inlined_call_operand.vmem [shape: f32[1,128], index: 6, kind: input, shape index: {}]   ;;  %s3766_s7 = inlined_call_operand.vmem [shape: f32[128,1], index: 7, kind: input, shape index: {}]   ;;  %s3767_s8 = inlined_call_operand.<no memory space> [shape: f32[1,1], index: 8, kind: input, shape index: {}]   ;;  %s3768_s9 = inlined_call_operand.vmem [shape: f32[64,1], index: 9, kind: output, shape index: {}]  }
   0x1   :  { %v48_v0 = vld [vmem:[%s3759_s1] sm:$0xf]  ;;  %v41_v2 = vld [vmem:[%s3760_s0 + $0x8] sm:$0xff]  ;;  %2101 = vmatprep.subr.mxu0 %v2716_v3  ;;  %2133 = vmatprep.mubr.msk.f32.mxu0 %vm2717_vm2, %v2716_v3  ;;  %v2784_v4 = vld [vmem:[%s3761_s2 + $0x78] sm:$0xff]  ;;  %vm1698_vm3 = vcmask 7168  }
   0x2   :  { %v40_v1 = vld [vmem:[%s3760_s0] sm:$0xff]  ;;  %2052 = vmatprep.subr.msk.mxu1 %vm81_vm0, %v48_v0  ;;  %2102 = vmatpush3.msra.mxu0 %v2784_v4  ;;  %v2792_v5 = vld [vmem:[%s3761_s2 + $0x70] sm:$0xff]  ;;  %v43_v7 = vld [vmem:[%s3760_s0 + $0x18] sm:$0xff] }
   0x3   :  { %2054 = vmatprep.mubr.msk.f32.mxu1 %vm56_vm1, %v40_v1  ;;  %2053 = vmatpush3.msk.msra.mxu1 %vm81_vm0, %v48_v0  ;;  %v42_v6 = vld [vmem:[%s3760_s0 + $0x10] sm:$0xff]  ;;  %v2806_v8 = vld [vmem:[%s3761_s2 + $0x68] sm:$0xff]  ;;  %v44_v9 = vld [vmem:[%s3760_s0 + $0x20] sm:$0xff] }
   0x4   :  { %2055 = vmatmul.mubr.msk.f32.vlgmr.msra.gmra.mxu1 %vm56_vm1, %v41_v2  ;;  %2066 = vmatprep.subr.mxu1 %v2716_v3  ;;  %v2818_v10 = vld [vmem:[%s3761_s2 + $0x60] sm:$0xff]  ;;  %v45_v11 = vld [vmem:[%s3760_s0 + $0x28] sm:$0xff]  ;;  %v2830_v12 = vld [vmem:[%s3761_s2 + $0x58] sm:$0xff] }
   0x5   :  { %2067 = vmatpush3.msra.mxu1 %v2784_v4  ;;  %2057 = vmatprep.mubr.msk.f32.mxu1 %vm56_vm1, %v42_v6  ;;  %v46_v13 = vld [vmem:[%s3760_s0 + $0x30] sm:$0xff]  ;;  %v47_v15 = vld [vmem:[%s3760_s0 + $0x38] sm:$0xff]  ;;  %v2854_v16 = vld [vmem:[%s3761_s2 + $0x48] sm:$0xff] }
   0x6   :  { %2068 = vmatprep.subr.mxu1 %v2716_v3  ;;  %2103 = vmatprep.subr.mxu0 %v2716_v3  ;;  %v2842_v14 = vld [vmem:[%s3761_s2 + $0x50] sm:$0xff]  ;;  %v2863_v17 = vld [vmem:[%s3761_s2 + $0x40] sm:$0xff]  ;;  %v2873_v18 = vld [vmem:[%s3761_s2 + $0x38] sm:$0xff] }
   0x7   :  { %2069 = vmatpush3.msra.mxu1 %v2792_v5  ;;  %2104 = vmatpush3.msra.mxu0 %v2792_v5  ;;  %v2882_v19 = vld [vmem:[%s3761_s2 + $0x30] sm:$0xff]  ;;  %v2891_v20 = vld [vmem:[%s3761_s2 + $0x28] sm:$0xff]  ;;  %v2900_v21 = vld [vmem:[%s3761_s2 + $0x20] sm:$0xff] }
   0x8   :  { %2070 = vmatprep.subr.mxu1 %v2716_v3  ;;  %2058 = vmatmul.mubr.msk.f32.gmra.mxu1 %vm56_vm1, %v43_v7  ;;  %v2909_v22 = vld [vmem:[%s3761_s2 + $0x18] sm:$0xff]  ;;  %v2918_v23 = vld [vmem:[%s3761_s2 + $0x10] sm:$0xff]  ;;  %v2927_v24 = vld [vmem:[%s3761_s2 + $0x8] sm:$0xff] }
   0x9   :  { %2071 = vmatpush3.msra.mxu1 %v2806_v8  ;;  %2060 = vmatprep.mubr.msk.f32.mxu1 %vm56_vm1, %v44_v9  ;;  %v2936_v25 = vld [vmem:[%s3761_s2] sm:$0xff]  ;;  %v831_v63 = vld [vmem:[%s3763_s4 + $0x78] sm:$0xff]  ;;  %v829_v6 = vld [vmem:[%s3763_s4 + $0x68] sm:$0xff] }
   0xa   :  { %2072 = vmatprep.subr.mxu1 %v2716_v3  ;;  %2105 = vmatprep.subr.mxu0 %v2716_v3  ;;  %v1711_v26 = vld [vmem:[%s3762_s3] ss:$0 sm:$0xff]  ;;  %v826_v9 = vld [vmem:[%s3763_s4 + $0x50] sm:$0xff] }
   0xb   :  { %2073 = vmatpush3.msra.mxu1 %v2818_v10  ;;  %2106 = vmatpush3.msra.mxu0 %v2806_v8  ;;  %v828_v7 = vld [vmem:[%s3763_s4 + $0x60] sm:$0xff] }
   0xc   :  { %2074 = vmatprep.subr.mxu1 %v2716_v3  ;;  %2061 = vmatmul.mubr.msk.f32.gmra.mxu1 %vm56_vm1, %v45_v11  ;;  %v824_v11 = vld [vmem:[%s3763_s4 + $0x40] sm:$0xff] }
   0xd   :  { %2075 = vmatpush3.msra.mxu1 %v2830_v12  ;;  %2063 = vmatprep.mubr.msk.f32.mxu1 %vm56_vm1, %v46_v13  ;;  %v822_v13 = vld [vmem:[%s3763_s4 + $0x30] sm:$0xff] }
   0xe   :  { %2076 = vmatprep.subr.mxu1 %v2716_v3  ;;  %2107 = vmatprep.subr.mxu0 %v2716_v3 }
   0xf   :  { %2077 = vmatpush3.msra.mxu1 %v2842_v14  ;;  %2108 = vmatpush3.msra.mxu0 %v2818_v10 }
  0x10   :  { %2078 = vmatprep.subr.mxu1 %v2716_v3  ;;  %2064 = vmatmul.mubr.msk.f32.gmra.mxu1 %vm56_vm1, %v47_v15  ;;  %v820_v15 = vld [vmem:[%s3763_s4 + $0x20] sm:$0xff] }
  0x11   :  { %2079 = vmatpush3.msra.mxu1 %v2854_v16  ;;  %2098 = vmatprep.mubr.msk.f32.mxu1 %vm2717_vm2, %v2716_v3 }
  0x12   :  { %2080 = vmatprep.subr.mxu1 %v2716_v3  ;;  %2109 = vmatprep.subr.mxu0 %v2716_v3 }
  0x13   :  { %2081 = vmatpush3.msra.mxu1 %v2863_v17  ;;  %2110 = vmatpush3.msra.mxu0 %v2830_v12 }
  0x14   :  { %2082 = vmatprep.subr.mxu1 %v2716_v3  ;;  %2111 = vmatprep.subr.mxu0 %v2716_v3 }
  0x15   :  { %2083 = vmatpush3.msra.mxu1 %v2873_v18  ;;  %2112 = vmatpush3.msra.mxu0 %v2842_v14 }
  0x16   :  { %2084 = vmatprep.subr.mxu1 %v2716_v3  ;;  %2113 = vmatprep.subr.mxu0 %v2716_v3 }
  0x17   :  { %2085 = vmatpush3.msra.mxu1 %v2882_v19  ;;  %2114 = vmatpush3.msra.mxu0 %v2854_v16 }
  0x18   :  { %2086 = vmatprep.subr.mxu1 %v2716_v3  ;;  %2115 = vmatprep.subr.mxu0 %v2716_v3 }
  0x19   :  { %2087 = vmatpush3.msra.mxu1 %v2891_v20  ;;  %2116 = vmatpush3.msra.mxu0 %v2863_v17 }
  0x1a   :  { %2088 = vmatprep.subr.mxu1 %v2716_v3  ;;  %2117 = vmatprep.subr.mxu0 %v2716_v3 }
  0x1b   :  { %2089 = vmatpush3.msra.mxu1 %v2900_v21  ;;  %2118 = vmatpush3.msra.mxu0 %v2873_v18 }
  0x1c   :  { %2090 = vmatprep.subr.mxu1 %v2716_v3  ;;  %2119 = vmatprep.subr.mxu0 %v2716_v3 }
  0x1d   :  { %2091 = vmatpush3.msra.mxu1 %v2909_v22  ;;  %2120 = vmatpush3.msra.mxu0 %v2882_v19 }
  0x1e   :  { %2092 = vmatprep.subr.mxu1 %v2716_v3  ;;  %2121 = vmatprep.subr.mxu0 %v2716_v3 }
  0x1f   :  { %2093 = vmatpush3.msra.mxu1 %v2918_v23  ;;  %2122 = vmatpush3.msra.mxu0 %v2891_v20 }
  0x20   :  { %2094 = vmatprep.subr.mxu1 %v2716_v3  ;;  %2123 = vmatprep.subr.mxu0 %v2716_v3 }
  0x21   :  { %2095 = vmatpush3.msra.mxu1 %v2927_v24  ;;  %2124 = vmatpush3.msra.mxu0 %v2900_v21 }
  0x22   :  { %2096 = vmatprep.subr.mxu1 %v2716_v3  ;;  %2125 = vmatprep.subr.mxu0 %v2716_v3 }
  0x23   :  { %2097 = vmatpush3.msra.mxu1 %v2936_v25  ;;  %2126 = vmatpush3.msra.mxu0 %v2909_v22 }
  0x24   :  { %2099 = vmatmul.mubr.f32.vlgmr.msra.gmra.mxu1 %v2716_v3  ;;  %2127 = vmatprep.subr.mxu0 %v2716_v3 }
  0x25   :  { %2128 = vmatpush3.msra.mxu0 %v2918_v23  ;;  %2136 = vmatprep.subr.mxu1 %v2716_v3 }
  0x26   :  { %2129 = vmatprep.subr.mxu0 %v2716_v3  ;;  %2137 = vmatpush3.msra.mxu1 %v2784_v4 }
  0x27   :  { %2130 = vmatpush3.msra.mxu0 %v2927_v24  ;;  %2138 = vmatprep.subr.mxu1 %v2716_v3 }
  0x28   :  { %2131 = vmatprep.subr.mxu0 %v2716_v3  ;;  %2139 = vmatpush3.msra.mxu1 %v2792_v5 }
  0x29   :  { %2132 = vmatpush3.msra.mxu0 %v2936_v25  ;;  %2140 = vmatprep.subr.mxu1 %v2716_v3 }
  0x2a   :  { %2141 = vmatpush3.msra.mxu1 %v2806_v8  ;;  %2168 = vmatprep.mubr.msk.f32.mxu1 %vm2717_vm2, %v2716_v3 }
  0x2b   :  { %2142 = vmatprep.subr.mxu1 %v2716_v3  ;;  %2171 = vmatprep.subr.mxu0 %v2716_v3 }
  0x2c   :  { %2143 = vmatpush3.msra.mxu1 %v2818_v10 }
  0x2d   :  { %2144 = vmatprep.subr.mxu1 %v2716_v3 }
  0x2e   :  { %2145 = vmatpush3.msra.mxu1 %v2830_v12 }
  0x2f   :  { %2146 = vmatprep.subr.mxu1 %v2716_v3 }
  0x30   :  { %2147 = vmatpush3.msra.mxu1 %v2842_v14 }
  0x31   :  { %2148 = vmatprep.subr.mxu1 %v2716_v3 }
  0x32   :  { %2149 = vmatpush3.msra.mxu1 %v2854_v16 }
  0x33   :  { %2150 = vmatprep.subr.mxu1 %v2716_v3 }
  0x34   :  { %2151 = vmatpush3.msra.mxu1 %v2863_v17 }
  0x35   :  { %2152 = vmatprep.subr.mxu1 %v2716_v3 }
  0x36   :  { %2153 = vmatpush3.msra.mxu1 %v2873_v18 }
  0x37   :  { %2154 = vmatprep.subr.mxu1 %v2716_v3 }
  0x38   :  { %2155 = vmatpush3.msra.mxu1 %v2882_v19 }
  0x39   :  { %2156 = vmatprep.subr.mxu1 %v2716_v3 }
  0x3a   :  { %2157 = vmatpush3.msra.mxu1 %v2891_v20 }
  0x3b   :  { %2158 = vmatprep.subr.mxu1 %v2716_v3 }
  0x3c   :  { %2159 = vmatpush3.msra.mxu1 %v2900_v21 }
  0x3d   :  { %2160 = vmatprep.subr.mxu1 %v2716_v3 }
  0x3e   :  { %2161 = vmatpush3.msra.mxu1 %v2909_v22 }
  0x3f   :  { %2162 = vmatprep.subr.mxu1 %v2716_v3 }
  0x40   :  { %2163 = vmatpush3.msra.mxu1 %v2918_v23 }
  0x41   :  { %2164 = vmatprep.subr.mxu1 %v2716_v3 }
  0x42   :  { %2165 = vmatpush3.msra.mxu1 %v2927_v24 }
  0x43   :  { %2166 = vmatprep.subr.mxu1 %v2716_v3 }
  0x44   :  { %2167 = vmatpush3.msra.mxu1 %v2936_v25 }
  0x45   :  { %2206 = vmatprep.subr.mxu1 %v2716_v3 }
  0xc4   :  { %v2056_v27 = vpop.f32.mrf.mxu1 }
  0xc5   :  { %v157_v28 = vadd.f32 %v2056_v27, %v1711_v26  ;;  %v3311_v27 = vld [vmem:[%s3764_s5 + $0x40] sm:$0xff] }
  0xc6   :  { %v151_v29 = vpop.f32.mrf.mxu1 }
  0xc7   :  { %v152_v42 = vadd.f32 %v1711_v26, %v151_v29  ;;  %v3325_v29 = vld [vmem:[%s3764_s5 + $0x30] sm:$0xff] }
  0xc8   :  { %v2059_v30 = vpop.f32.mrf.mxu1 }
  0xc9   :  { %v2991_v31 = vadd.f32 %v2059_v30, %v1711_v26  ;;  %v3332_v30 = vld [vmem:[%s3764_s5 + $0x28] sm:$0xff] }
  0xca   :  { %v161_v32 = vpop.f32.mrf.mxu1 }
  0xcb   :  { %v2993_v33 = vadd.f32 %v1711_v26, %v161_v32  ;;  %v3346_v32 = vld [vmem:[%s3764_s5 + $0x18] sm:$0xff] }
  0xcc   :  { %v2062_v34 = vpop.f32.mrf.mxu1 }
  0xcd   :  { %v2995_v35 = vadd.f32 %v2062_v34, %v1711_v26  ;;  %v3360_v34 = vld [vmem:[%s3764_s5 + $0x8] sm:$0xff] }
  0xce   :  { %v171_v36 = vpop.f32.mrf.mxu1 }
  0xcf   :  { %v2997_v37 = vadd.f32 %v1711_v26, %v171_v36 }
  0xd0   :  { %v2065_v38 = vpop.f32.mrf.mxu1 }
  0xd1   :  { %v2999_v39 = vadd.f32 %v2065_v38, %v1711_v26 }
  0xd2   :  { %v181_v40 = vpop.f32.mrf.mxu1 }
  0xd3   :  { %v3001_v41 = vadd.f32 %v1711_v26, %v181_v40  ;;  %v3304_v26 = vld [vmem:[%s3764_s5 + $0x48] sm:$0xff] }
  0xe4   :  { %v282_v43 = vpop.f32.mrf.mxu1 }
  0xe5   :  { %v3003_v44 = vadd.f32 %v282_v43, %v152_v42 }
  0xe6   :  { %v2100_v45 = vpop.f32.mrf.mxu1 }
  0xe7   :  { %v287_v46 = vmax.f32 %v3003_v44, 0.0 }
  0xe9   :  { %2134 = vmatmul.mubr.f32.vlgmr.msra.gmra.mxu0 %v287_v46 }
  0xea   :  { %2172 = vmatpush3.msra.mxu0 %v2784_v4  ;;  %2203 = vmatprep.mubr.msk.f32.mxu0 %vm2717_vm2, %v2716_v3 }
  0xeb   :  { %2173 = vmatprep.subr.mxu0 %v2716_v3 }
  0xec   :  { %2174 = vmatpush3.msra.mxu0 %v2792_v5 }
  0xed   :  { %2175 = vmatprep.subr.mxu0 %v2716_v3 }
  0xee   :  { %2176 = vmatpush3.msra.mxu0 %v2806_v8 }
  0xef   :  { %2177 = vmatprep.subr.mxu0 %v2716_v3 }
  0xf0   :  { %2178 = vmatpush3.msra.mxu0 %v2818_v10 }
  0xf1   :  { %2179 = vmatprep.subr.mxu0 %v2716_v3 }
  0xf2   :  { %2180 = vmatpush3.msra.mxu0 %v2830_v12 }
  0xf3   :  { %2181 = vmatprep.subr.mxu0 %v2716_v3 }
  0xf4   :  { %2182 = vmatpush3.msra.mxu0 %v2842_v14 }
  0xf5   :  { %2183 = vmatprep.subr.mxu0 %v2716_v3 }
  0xf6   :  { %2184 = vmatpush3.msra.mxu0 %v2854_v16 }
  0xf7   :  { %2185 = vmatprep.subr.mxu0 %v2716_v3 }
  0xf8   :  { %2186 = vmatpush3.msra.mxu0 %v2863_v17 }
  0xf9   :  { %2187 = vmatprep.subr.mxu0 %v2716_v3 }
  0xfa   :  { %2188 = vmatpush3.msra.mxu0 %v2873_v18 }
  0xfb   :  { %2189 = vmatprep.subr.mxu0 %v2716_v3 }
  0xfc   :  { %2190 = vmatpush3.msra.mxu0 %v2882_v19 }
  0xfd   :  { %2191 = vmatprep.subr.mxu0 %v2716_v3 }
  0xfe   :  { %2192 = vmatpush3.msra.mxu0 %v2891_v20 }
  0xff   :  { %2193 = vmatprep.subr.mxu0 %v2716_v3 }
 0x100   :  { %2194 = vmatpush3.msra.mxu0 %v2900_v21 }
 0x101   :  { %2195 = vmatprep.subr.mxu0 %v2716_v3 }
 0x102   :  { %2196 = vmatpush3.msra.mxu0 %v2909_v22 }
 0x103   :  { %2197 = vmatprep.subr.mxu0 %v2716_v3 }
 0x104   :  { %2198 = vmatpush3.msra.mxu0 %v2918_v23 }
 0x105   :  { %2199 = vmatprep.subr.mxu0 %v2716_v3 }
 0x106   :  { %2200 = vmatpush3.msra.mxu0 %v2927_v24 }
 0x107   :  { %2201 = vmatprep.subr.mxu0 %v2716_v3 }
 0x108   :  { %2202 = vmatpush3.msra.mxu0 %v2936_v25 }
 0x109   :  { %2241 = vmatprep.subr.mxu0 %v2716_v3 }
 0x1a9   :  { %v356_v47 = vpop.f32.mrf.mxu0 }
 0x1aa   :  { %v3042_v48 = vadd.f32 %v356_v47, %v157_v28  ;;  %v3318_v28 = vld [vmem:[%s3764_s5 + $0x38] sm:$0xff]  ;;  %v3448_v47 = vld [vmem:[%s3765_s6] ss:$0 sm:$0xff] }
 0x1ab   :  { %v2135_v49 = vpop.f32.mrf.mxu0 }
 0x1ac   :  { %v361_v50 = vmax.f32 %v3042_v48, 0.0 }
 0x1ae   :  { %2169 = vmatmul.mubr.f32.vlgmr.msra.gmra.mxu1 %v361_v50 }
 0x1af   :  { %2207 = vmatpush3.msra.mxu1 %v2784_v4  ;;  %2238 = vmatprep.mubr.msk.f32.mxu1 %vm2717_vm2, %v2716_v3 }
 0x1b0   :  { %2208 = vmatprep.subr.mxu1 %v2716_v3 }
 0x1b1   :  { %2209 = vmatpush3.msra.mxu1 %v2792_v5 }
 0x1b2   :  { %2210 = vmatprep.subr.mxu1 %v2716_v3 }
 0x1b3   :  { %2211 = vmatpush3.msra.mxu1 %v2806_v8 }
 0x1b4   :  { %2212 = vmatprep.subr.mxu1 %v2716_v3 }
 0x1b5   :  { %2213 = vmatpush3.msra.mxu1 %v2818_v10 }
 0x1b6   :  { %2214 = vmatprep.subr.mxu1 %v2716_v3 }
 0x1b7   :  { %2215 = vmatpush3.msra.mxu1 %v2830_v12 }
 0x1b8   :  { %2216 = vmatprep.subr.mxu1 %v2716_v3 }
 0x1b9   :  { %2217 = vmatpush3.msra.mxu1 %v2842_v14 }
 0x1ba   :  { %2218 = vmatprep.subr.mxu1 %v2716_v3 }
 0x1bb   :  { %2219 = vmatpush3.msra.mxu1 %v2854_v16 }
 0x1bc   :  { %2220 = vmatprep.subr.mxu1 %v2716_v3 }
 0x1bd   :  { %2221 = vmatpush3.msra.mxu1 %v2863_v17 }
 0x1be   :  { %2222 = vmatprep.subr.mxu1 %v2716_v3 }
 0x1bf   :  { %2223 = vmatpush3.msra.mxu1 %v2873_v18 }
 0x1c0   :  { %2224 = vmatprep.subr.mxu1 %v2716_v3 }
 0x1c1   :  { %2225 = vmatpush3.msra.mxu1 %v2882_v19 }
 0x1c2   :  { %2226 = vmatprep.subr.mxu1 %v2716_v3 }
 0x1c3   :  { %2227 = vmatpush3.msra.mxu1 %v2891_v20 }
 0x1c4   :  { %2228 = vmatprep.subr.mxu1 %v2716_v3 }
 0x1c5   :  { %2229 = vmatpush3.msra.mxu1 %v2900_v21 }
 0x1c6   :  { %2230 = vmatprep.subr.mxu1 %v2716_v3 }
 0x1c7   :  { %2231 = vmatpush3.msra.mxu1 %v2909_v22 }
 0x1c8   :  { %2232 = vmatprep.subr.mxu1 %v2716_v3 }
 0x1c9   :  { %2233 = vmatpush3.msra.mxu1 %v2918_v23 }
 0x1ca   :  { %2234 = vmatprep.subr.mxu1 %v2716_v3 }
 0x1cb   :  { %2235 = vmatpush3.msra.mxu1 %v2927_v24 }
 0x1cc   :  { %2236 = vmatprep.subr.mxu1 %v2716_v3 }
 0x1cd   :  { %2237 = vmatpush3.msra.mxu1 %v2936_v25 }
 0x1ce   :  { %2276 = vmatprep.subr.mxu1 %v2716_v3 }
 0x26e   :  { %v430_v51 = vpop.f32.mrf.mxu1 }
 0x26f   :  { %v3082_v52 = vadd.f32 %v430_v51, %v2993_v33  ;;  %v3353_v33 = vld [vmem:[%s3764_s5 + $0x10] sm:$0xff] }
 0x270   :  { %v2170_v53 = vpop.f32.mrf.mxu1 }
 0x271   :  { %v435_v54 = vmax.f32 %v3082_v52, 0.0 }
 0x273   :  { %2204 = vmatmul.mubr.f32.vlgmr.msra.gmra.mxu0 %v435_v54 }
 0x274   :  { %2242 = vmatpush3.msra.mxu0 %v2784_v4  ;;  %2273 = vmatprep.mubr.msk.f32.mxu0 %vm2717_vm2, %v2716_v3 }
 0x275   :  { %2243 = vmatprep.subr.mxu0 %v2716_v3 }
 0x276   :  { %2244 = vmatpush3.msra.mxu0 %v2792_v5 }
 0x277   :  { %2245 = vmatprep.subr.mxu0 %v2716_v3 }
 0x278   :  { %2246 = vmatpush3.msra.mxu0 %v2806_v8 }
 0x279   :  { %2247 = vmatprep.subr.mxu0 %v2716_v3 }
 0x27a   :  { %2248 = vmatpush3.msra.mxu0 %v2818_v10 }
 0x27b   :  { %2249 = vmatprep.subr.mxu0 %v2716_v3 }
 0x27c   :  { %2250 = vmatpush3.msra.mxu0 %v2830_v12 }
 0x27d   :  { %2251 = vmatprep.subr.mxu0 %v2716_v3 }
 0x27e   :  { %2252 = vmatpush3.msra.mxu0 %v2842_v14 }
 0x27f   :  { %2253 = vmatprep.subr.mxu0 %v2716_v3 }
 0x280   :  { %2254 = vmatpush3.msra.mxu0 %v2854_v16 }
 0x281   :  { %2255 = vmatprep.subr.mxu0 %v2716_v3 }
 0x282   :  { %2256 = vmatpush3.msra.mxu0 %v2863_v17 }
 0x283   :  { %2257 = vmatprep.subr.mxu0 %v2716_v3 }
 0x284   :  { %2258 = vmatpush3.msra.mxu0 %v2873_v18 }
 0x285   :  { %2259 = vmatprep.subr.mxu0 %v2716_v3 }
 0x286   :  { %2260 = vmatpush3.msra.mxu0 %v2882_v19 }
 0x287   :  { %2261 = vmatprep.subr.mxu0 %v2716_v3 }
 0x288   :  { %2262 = vmatpush3.msra.mxu0 %v2891_v20 }
 0x289   :  { %2263 = vmatprep.subr.mxu0 %v2716_v3 }
 0x28a   :  { %2264 = vmatpush3.msra.mxu0 %v2900_v21 }
 0x28b   :  { %2265 = vmatprep.subr.mxu0 %v2716_v3 }
 0x28c   :  { %2266 = vmatpush3.msra.mxu0 %v2909_v22 }
 0x28d   :  { %2267 = vmatprep.subr.mxu0 %v2716_v3 }
 0x28e   :  { %2268 = vmatpush3.msra.mxu0 %v2918_v23 }
 0x28f   :  { %2269 = vmatprep.subr.mxu0 %v2716_v3 }
 0x290   :  { %2270 = vmatpush3.msra.mxu0 %v2927_v24 }
 0x291   :  { %2271 = vmatprep.subr.mxu0 %v2716_v3 }
 0x292   :  { %2272 = vmatpush3.msra.mxu0 %v2936_v25 }
 0x293   :  { %2311 = vmatprep.subr.mxu0 %v2716_v3 }
 0x333   :  { %v504_v55 = vpop.f32.mrf.mxu0 }
 0x334   :  { %v3122_v56 = vadd.f32 %v504_v55, %v2991_v31  ;;  %v3339_v31 = vld [vmem:[%s3764_s5 + $0x20] sm:$0xff] }
 0x335   :  { %v2205_v57 = vpop.f32.mrf.mxu0 }
 0x336   :  { %v509_v58 = vmax.f32 %v3122_v56, 0.0 }
 0x338   :  { %2239 = vmatmul.mubr.f32.vlgmr.msra.gmra.mxu1 %v509_v58 }
 0x339   :  { %2277 = vmatpush3.msra.mxu1 %v2784_v4  ;;  %2308 = vmatprep.mubr.msk.f32.mxu1 %vm2717_vm2, %v2716_v3 }
 0x33a   :  { %2278 = vmatprep.subr.mxu1 %v2716_v3 }
 0x33b   :  { %2279 = vmatpush3.msra.mxu1 %v2792_v5 }
 0x33c   :  { %2280 = vmatprep.subr.mxu1 %v2716_v3 }
 0x33d   :  { %2281 = vmatpush3.msra.mxu1 %v2806_v8 }
 0x33e   :  { %2282 = vmatprep.subr.mxu1 %v2716_v3 }
 0x33f   :  { %2283 = vmatpush3.msra.mxu1 %v2818_v10 }
 0x340   :  { %2284 = vmatprep.subr.mxu1 %v2716_v3 }
 0x341   :  { %2285 = vmatpush3.msra.mxu1 %v2830_v12 }
 0x342   :  { %2286 = vmatprep.subr.mxu1 %v2716_v3 }
 0x343   :  { %2287 = vmatpush3.msra.mxu1 %v2842_v14 }
 0x344   :  { %2288 = vmatprep.subr.mxu1 %v2716_v3 }
 0x345   :  { %2289 = vmatpush3.msra.mxu1 %v2854_v16 }
 0x346   :  { %2290 = vmatprep.subr.mxu1 %v2716_v3 }
 0x347   :  { %2291 = vmatpush3.msra.mxu1 %v2863_v17 }
 0x348   :  { %2292 = vmatprep.subr.mxu1 %v2716_v3 }
 0x349   :  { %2293 = vmatpush3.msra.mxu1 %v2873_v18 }
 0x34a   :  { %2294 = vmatprep.subr.mxu1 %v2716_v3 }
 0x34b   :  { %2295 = vmatpush3.msra.mxu1 %v2882_v19 }
 0x34c   :  { %2296 = vmatprep.subr.mxu1 %v2716_v3 }
 0x34d   :  { %2297 = vmatpush3.msra.mxu1 %v2891_v20 }
 0x34e   :  { %2298 = vmatprep.subr.mxu1 %v2716_v3 }
 0x34f   :  { %2299 = vmatpush3.msra.mxu1 %v2900_v21 }
 0x350   :  { %2300 = vmatprep.subr.mxu1 %v2716_v3 }
 0x351   :  { %2301 = vmatpush3.msra.mxu1 %v2909_v22 }
 0x352   :  { %2302 = vmatprep.subr.mxu1 %v2716_v3 }
 0x353   :  { %2303 = vmatpush3.msra.mxu1 %v2918_v23 }
 0x354   :  { %2304 = vmatprep.subr.mxu1 %v2716_v3 }
 0x355   :  { %2305 = vmatpush3.msra.mxu1 %v2927_v24 }
 0x356   :  { %2306 = vmatprep.subr.mxu1 %v2716_v3 }
 0x357   :  { %2307 = vmatpush3.msra.mxu1 %v2936_v25 }
 0x358   :  { %2346 = vmatprep.subr.mxu1 %v831_v63 }
 0x3f8   :  { %v578_v59 = vpop.f32.mrf.mxu1 }
 0x3f9   :  { %v3161_v60 = vadd.f32 %v578_v59, %v2997_v37 }
 0x3fa   :  { %v2240_v61 = vpop.f32.mrf.mxu1 }
 0x3fb   :  { %v583_v62 = vmax.f32 %v3161_v60, 0.0 }
 0x3fd   :  { %2274 = vmatmul.mubr.f32.vlgmr.msra.gmra.mxu0 %v583_v62 }
 0x3fe   :  { %2312 = vmatpush3.msra.mxu0 %v2784_v4  ;;  %2343 = vmatprep.mubr.msk.f32.mxu0 %vm2717_vm2, %v2716_v3 }
 0x3ff   :  { %2313 = vmatprep.subr.mxu0 %v2716_v3 }
 0x400   :  { %2314 = vmatpush3.msra.mxu0 %v2792_v5  ;;  %v830_v5 = vld [vmem:[%s3763_s4 + $0x70] sm:$0xff] }
 0x401   :  { %2315 = vmatprep.subr.mxu0 %v2716_v3 }
 0x402   :  { %2316 = vmatpush3.msra.mxu0 %v2806_v8  ;;  %v827_v8 = vld [vmem:[%s3763_s4 + $0x58] sm:$0xff] }
 0x403   :  { %2317 = vmatprep.subr.mxu0 %v2716_v3 }
 0x404   :  { %2318 = vmatpush3.msra.mxu0 %v2818_v10  ;;  %v825_v10 = vld [vmem:[%s3763_s4 + $0x48] sm:$0xff] }
 0x405   :  { %2319 = vmatprep.subr.mxu0 %v2716_v3 }
 0x406   :  { %2320 = vmatpush3.msra.mxu0 %v2830_v12  ;;  %v823_v12 = vld [vmem:[%s3763_s4 + $0x38] sm:$0xff] }
 0x407   :  { %2321 = vmatprep.subr.mxu0 %v2716_v3 }
 0x408   :  { %2322 = vmatpush3.msra.mxu0 %v2842_v14  ;;  %v821_v14 = vld [vmem:[%s3763_s4 + $0x28] sm:$0xff] }
 0x409   :  { %2323 = vmatprep.subr.mxu0 %v2716_v3 }
 0x40a   :  { %2324 = vmatpush3.msra.mxu0 %v2854_v16  ;;  %v819_v16 = vld [vmem:[%s3763_s4 + $0x18] sm:$0xff] }
 0x40b   :  { %2325 = vmatprep.subr.mxu0 %v2716_v3 }
 0x40c   :  { %2326 = vmatpush3.msra.mxu0 %v2863_v17  ;;  %v818_v17 = vld [vmem:[%s3763_s4 + $0x10] sm:$0xff] }
 0x40d   :  { %2327 = vmatprep.subr.mxu0 %v2716_v3 }
 0x40e   :  { %2328 = vmatpush3.msra.mxu0 %v2873_v18  ;;  %v817_v18 = vld [vmem:[%s3763_s4 + $0x8] sm:$0xff] }
 0x40f   :  { %2329 = vmatprep.subr.mxu0 %v2716_v3 }
 0x410   :  { %2330 = vmatpush3.msra.mxu0 %v2882_v19  ;;  %v816_v19 = vld [vmem:[%s3763_s4] sm:$0xff] }
 0x411   :  { %2331 = vmatprep.subr.mxu0 %v2716_v3 }
 0x412   :  { %2332 = vmatpush3.msra.mxu0 %v2891_v20  ;;  %v3263_v20 = vld [vmem:[%s3764_s5 + $0x78] sm:$0xff] }
 0x413   :  { %2333 = vmatprep.subr.mxu0 %v2716_v3 }
 0x414   :  { %2334 = vmatpush3.msra.mxu0 %v2900_v21  ;;  %v3269_v21 = vld [vmem:[%s3764_s5 + $0x70] sm:$0xff] }
 0x415   :  { %2335 = vmatprep.subr.mxu0 %v2716_v3 }
 0x416   :  { %2336 = vmatpush3.msra.mxu0 %v2909_v22  ;;  %v3276_v22 = vld [vmem:[%s3764_s5 + $0x68] sm:$0xff] }
 0x417   :  { %2337 = vmatprep.subr.mxu0 %v2716_v3 }
 0x418   :  { %2338 = vmatpush3.msra.mxu0 %v2918_v23  ;;  %v3283_v23 = vld [vmem:[%s3764_s5 + $0x60] sm:$0xff] }
 0x419   :  { %2339 = vmatprep.subr.mxu0 %v2716_v3 }
 0x41a   :  { %2340 = vmatpush3.msra.mxu0 %v2927_v24  ;;  %v3290_v24 = vld [vmem:[%s3764_s5 + $0x58] sm:$0xff] }
 0x41b   :  { %2341 = vmatprep.subr.mxu0 %v2716_v3 }
 0x41c   :  { %2342 = vmatpush3.msra.mxu0 %v2936_v25  ;;  %v3297_v25 = vld [vmem:[%s3764_s5 + $0x50] sm:$0xff] }
 0x41d   :  { %2390 = vmatprep.subr.mxu0 %v2716_v3 }
 0x4bd   :  { %v652_v0 = vpop.f32.mrf.mxu0 }
 0x4be   :  { %v656_v1 = vadd.f32 %v652_v0, %v2995_v35  ;;  %v3367_v35 = vld [vmem:[%s3764_s5] sm:$0xff] }
 0x4bf   :  { %v2275_v2 = vpop.f32.mrf.mxu0 }
 0x4c0   :  { %v657_v4 = vmax.f32 %v656_v1, 0.0 }
 0x4c2   :  { %2309 = vmatmul.mubr.f32.vlgmr.msra.gmra.mxu1 %v657_v4 }
 0x4c3   :  { %2347 = vmatpush3.msra.mxu1 %v831_v63  ;;  %2378 = vmatprep.mubr.f32.mxu1 %v287_v46 }
 0x4c4   :  { %2348 = vmatprep.subr.mxu1 %v830_v5 }
 0x4c5   :  { %2349 = vmatpush3.msra.mxu1 %v830_v5 }
 0x4c6   :  { %2350 = vmatprep.subr.mxu1 %v829_v6 }
 0x4c7   :  { %2351 = vmatpush3.msra.mxu1 %v829_v6 }
 0x4c8   :  { %2352 = vmatprep.subr.mxu1 %v828_v7 }
 0x4c9   :  { %2353 = vmatpush3.msra.mxu1 %v828_v7 }
 0x4ca   :  { %2354 = vmatprep.subr.mxu1 %v827_v8 }
 0x4cb   :  { %2355 = vmatpush3.msra.mxu1 %v827_v8 }
 0x4cc   :  { %2356 = vmatprep.subr.mxu1 %v826_v9 }
 0x4cd   :  { %2357 = vmatpush3.msra.mxu1 %v826_v9 }
 0x4ce   :  { %2358 = vmatprep.subr.mxu1 %v825_v10 }
 0x4cf   :  { %2359 = vmatpush3.msra.mxu1 %v825_v10 }
 0x4d0   :  { %2360 = vmatprep.subr.mxu1 %v824_v11 }
 0x4d1   :  { %2361 = vmatpush3.msra.mxu1 %v824_v11 }
 0x4d2   :  { %2362 = vmatprep.subr.mxu1 %v823_v12 }
 0x4d3   :  { %2363 = vmatpush3.msra.mxu1 %v823_v12 }
 0x4d4   :  { %2364 = vmatprep.subr.mxu1 %v822_v13 }
 0x4d5   :  { %2365 = vmatpush3.msra.mxu1 %v822_v13 }
 0x4d6   :  { %2366 = vmatprep.subr.mxu1 %v821_v14 }
 0x4d7   :  { %2367 = vmatpush3.msra.mxu1 %v821_v14 }
 0x4d8   :  { %2368 = vmatprep.subr.mxu1 %v820_v15 }
 0x4d9   :  { %2369 = vmatpush3.msra.mxu1 %v820_v15  ;;  %v1585_v15 = vld [vmem:[%s3766_s7 + $0x78] sm:$0xff] }
 0x4da   :  { %2370 = vmatprep.subr.mxu1 %v819_v16 }
 0x4db   :  { %2371 = vmatpush3.msra.mxu1 %v819_v16 }
 0x4dc   :  { %2372 = vmatprep.subr.mxu1 %v818_v17 }
 0x4dd   :  { %2373 = vmatpush3.msra.mxu1 %v818_v17 }
 0x4de   :  { %2374 = vmatprep.subr.mxu1 %v817_v18 }
 0x4df   :  { %2375 = vmatpush3.msra.mxu1 %v817_v18 }
 0x4e0   :  { %2376 = vmatprep.subr.mxu1 %v816_v19 }
 0x4e1   :  { %2377 = vmatpush3.msra.mxu1 %v816_v19 }
 0x4e2   :  { %2379 = vmatmul.mubr.f32.vlgmr.msra.gmra.mxu1 %v361_v50  ;;  %2425 = vmatprep.subr.mxu1 %v2716_v3 }
 0x4e3   :  { %2381 = vmatprep.mubr.f32.mxu1 %v435_v54  ;;  %2426 = vmatpush3.msra.mxu1 %v3263_v20 }
 0x4e4   :  { %2427 = vmatprep.subr.mxu1 %v2716_v3 }
 0x4e5   :  { %2428 = vmatpush3.msra.mxu1 %v3269_v21 }
 0x4e6   :  { %2382 = vmatmul.mubr.f32.gmra.mxu1 %v509_v58  ;;  %2429 = vmatprep.subr.mxu1 %v2716_v3 }
 0x4e7   :  { %2384 = vmatprep.mubr.f32.mxu1 %v583_v62  ;;  %2430 = vmatpush3.msra.mxu1 %v3276_v22 }
 0x4e8   :  { %2431 = vmatprep.subr.mxu1 %v2716_v3 }
 0x4e9   :  { %2432 = vmatpush3.msra.mxu1 %v3283_v23 }
 0x4ea   :  { %2385 = vmatmul.mubr.f32.gmra.mxu1 %v657_v4  ;;  %2433 = vmatprep.subr.mxu1 %v2716_v3 }
 0x4eb   :  { %2434 = vmatpush3.msra.mxu1 %v3290_v24 }
 0x4ec   :  { %2435 = vmatprep.subr.mxu1 %v2716_v3 }
 0x4ed   :  { %2436 = vmatpush3.msra.mxu1 %v3297_v25 }
 0x4ee   :  { %2437 = vmatprep.subr.mxu1 %v2716_v3 }
 0x4ef   :  { %2438 = vmatpush3.msra.mxu1 %v3304_v26 }
 0x4f0   :  { %2439 = vmatprep.subr.mxu1 %v2716_v3 }
 0x4f1   :  { %2440 = vmatpush3.msra.mxu1 %v3311_v27 }
 0x4f2   :  { %2441 = vmatprep.subr.mxu1 %v2716_v3 }
 0x4f3   :  { %2442 = vmatpush3.msra.mxu1 %v3318_v28 }
 0x4f4   :  { %2443 = vmatprep.subr.mxu1 %v2716_v3 }
 0x4f5   :  { %2444 = vmatpush3.msra.mxu1 %v3325_v29 }
 0x4f6   :  { %2445 = vmatprep.subr.mxu1 %v2716_v3 }
 0x4f7   :  { %2446 = vmatpush3.msra.mxu1 %v3332_v30 }
 0x4f8   :  { %2447 = vmatprep.subr.mxu1 %v2716_v3 }
 0x4f9   :  { %2448 = vmatpush3.msra.mxu1 %v3339_v31 }
 0x4fa   :  { %2449 = vmatprep.subr.mxu1 %v2716_v3 }
 0x4fb   :  { %2450 = vmatpush3.msra.mxu1 %v3346_v32 }
 0x4fc   :  { %2451 = vmatprep.subr.mxu1 %v2716_v3 }
 0x4fd   :  { %2452 = vmatpush3.msra.mxu1 %v3353_v33 }
 0x4fe   :  { %2453 = vmatprep.subr.mxu1 %v2716_v3 }
 0x4ff   :  { %2454 = vmatpush3.msra.mxu1 %v3360_v34 }
 0x500   :  { %2455 = vmatprep.subr.mxu1 %v2716_v3 }
 0x501   :  { %2456 = vmatpush3.msra.mxu1 %v3367_v35 }
 0x502   :  { %2495 = vmatprep.subr.mxu1 %v2716_v3 }
 0x582   :  { %v726_v36 = vpop.f32.mrf.mxu1 }
 0x583   :  { %v730_v37 = vadd.f32 %v726_v36, %v3001_v41 }
 0x584   :  { %v2310_v38 = vpop.f32.mrf.mxu1 }
 0x585   :  { %v731_v40 = vmax.f32 %v730_v37, 0.0 }
 0x587   :  { %2344 = vmatmul.mubr.f32.vlgmr.msra.gmra.mxu0 %v731_v40  ;;  %2387 = vmatprep.mubr.f32.mxu1 %v731_v40 }
 0x588   :  { %2391 = vmatpush3.msra.mxu0 %v3263_v20  ;;  %2422 = vmatprep.mubr.msk.f32.mxu0 %vm2717_vm2, %v2716_v3 }
 0x589   :  { %2392 = vmatprep.subr.mxu0 %v2716_v3 }
 0x58a   :  { %2393 = vmatpush3.msra.mxu0 %v3269_v21 }
 0x58b   :  { %2394 = vmatprep.subr.mxu0 %v2716_v3 }
 0x58c   :  { %2395 = vmatpush3.msra.mxu0 %v3276_v22 }
 0x58d   :  { %2396 = vmatprep.subr.mxu0 %v2716_v3 }
 0x58e   :  { %2397 = vmatpush3.msra.mxu0 %v3283_v23 }
 0x58f   :  { %2398 = vmatprep.subr.mxu0 %v2716_v3 }
 0x590   :  { %2399 = vmatpush3.msra.mxu0 %v3290_v24 }
 0x591   :  { %2400 = vmatprep.subr.mxu0 %v2716_v3 }
 0x592   :  { %2401 = vmatpush3.msra.mxu0 %v3297_v25 }
 0x593   :  { %2402 = vmatprep.subr.mxu0 %v2716_v3 }
 0x594   :  { %2403 = vmatpush3.msra.mxu0 %v3304_v26 }
 0x595   :  { %2404 = vmatprep.subr.mxu0 %v2716_v3 }
 0x596   :  { %2405 = vmatpush3.msra.mxu0 %v3311_v27 }
 0x597   :  { %2406 = vmatprep.subr.mxu0 %v2716_v3 }
 0x598   :  { %2407 = vmatpush3.msra.mxu0 %v3318_v28 }
 0x599   :  { %2408 = vmatprep.subr.mxu0 %v2716_v3 }
 0x59a   :  { %2409 = vmatpush3.msra.mxu0 %v3325_v29 }
 0x59b   :  { %2410 = vmatprep.subr.mxu0 %v2716_v3 }
 0x59c   :  { %2411 = vmatpush3.msra.mxu0 %v3332_v30 }
 0x59d   :  { %2412 = vmatprep.subr.mxu0 %v2716_v3 }
 0x59e   :  { %2413 = vmatpush3.msra.mxu0 %v3339_v31 }
 0x59f   :  { %2414 = vmatprep.subr.mxu0 %v2716_v3 }
 0x5a0   :  { %2415 = vmatpush3.msra.mxu0 %v3346_v32 }
 0x5a1   :  { %2416 = vmatprep.subr.mxu0 %v2716_v3 }
 0x5a2   :  { %2417 = vmatpush3.msra.mxu0 %v3353_v33  ;;  %v2380_v45 = vpop.f32.mrf.mxu1 }
 0x5a3   :  { %2418 = vmatprep.subr.mxu0 %v2716_v3  ;;  %v911_v58 = vadd.f32 %v2380_v45, %v3448_v47 }
 0x5a4   :  { %2419 = vmatpush3.msra.mxu0 %v3360_v34  ;;  %v905_v46 = vpop.f32.mrf.mxu1 }
 0x5a5   :  { %2420 = vmatprep.subr.mxu0 %v2716_v3  ;;  %v906_v48 = vadd.f32 %v3448_v47, %v905_v46 }
 0x5a6   :  { %2421 = vmatpush3.msra.mxu0 %v3367_v35  ;;  %v3490_v52 = vpop.f32.mrf.mxu1 }
 0x5a7   :  { %2423 = vmatmul.mubr.f32.vlgmr.msra.gmra.mxu0 %v2716_v3  ;;  %2460 = vmatprep.subr.mxu0 %v2716_v3  ;;  %v921_v5 = vadd.f32 %v3490_v52, %v3448_v47 }
 0x5a8   :  { %2461 = vmatpush3.msra.mxu0 %v3263_v20  ;;  %2492 = vmatprep.mubr.msk.f32.mxu0 %vm2717_vm2, %v2716_v3  ;;  %v915_v53 = vpop.f32.mrf.mxu1 }
 0x5a9   :  { %2462 = vmatprep.subr.mxu0 %v2716_v3  ;;  %v916_v63 = vadd.f32 %v3448_v47, %v915_v53 }
 0x5aa   :  { %2463 = vmatpush3.msra.mxu0 %v3269_v21  ;;  %v3492_v54 = vpop.f32.mrf.mxu1 }
 0x5ab   :  { %2464 = vmatprep.subr.mxu0 %v2716_v3  ;;  %v931_v16 = vadd.f32 %v3492_v54, %v3448_v47 }
 0x5ac   :  { %2465 = vmatpush3.msra.mxu0 %v3276_v22  ;;  %v3494_v55 = vpop.f32.mrf.mxu1 }
 0x5ad   :  { %2466 = vmatprep.subr.mxu0 %v2716_v3  ;;  %v926_v10 = vadd.f32 %v3448_v47, %v3494_v55 }
 0x5ae   :  { %2467 = vmatpush3.msra.mxu0 %v3283_v23 }
 0x5af   :  { %2468 = vmatprep.subr.mxu0 %v2716_v3 }
 0x5b0   :  { %2469 = vmatpush3.msra.mxu0 %v3290_v24 }
 0x5b1   :  { %2470 = vmatprep.subr.mxu0 %v2716_v3 }
 0x5b2   :  { %2471 = vmatpush3.msra.mxu0 %v3297_v25 }
 0x5b3   :  { %2472 = vmatprep.subr.mxu0 %v2716_v3 }
 0x5b4   :  { %2473 = vmatpush3.msra.mxu0 %v3304_v26 }
 0x5b5   :  { %2474 = vmatprep.subr.mxu0 %v2716_v3 }
 0x5b6   :  { %2475 = vmatpush3.msra.mxu0 %v3311_v27 }
 0x5b7   :  { %2476 = vmatprep.subr.mxu0 %v2716_v3 }
 0x5b8   :  { %2477 = vmatpush3.msra.mxu0 %v3318_v28 }
 0x5b9   :  { %2478 = vmatprep.subr.mxu0 %v2716_v3 }
 0x5ba   :  { %2479 = vmatpush3.msra.mxu0 %v3325_v29 }
 0x5bb   :  { %2480 = vmatprep.subr.mxu0 %v2716_v3 }
 0x5bc   :  { %2481 = vmatpush3.msra.mxu0 %v3332_v30 }
 0x5bd   :  { %2482 = vmatprep.subr.mxu0 %v2716_v3 }
 0x5be   :  { %2483 = vmatpush3.msra.mxu0 %v3339_v31 }
 0x5bf   :  { %2484 = vmatprep.subr.mxu0 %v2716_v3 }
 0x5c0   :  { %2485 = vmatpush3.msra.mxu0 %v3346_v32 }
 0x5c1   :  { %2486 = vmatprep.subr.mxu0 %v2716_v3 }
 0x5c2   :  { %2487 = vmatpush3.msra.mxu0 %v3353_v33 }
 0x5c3   :  { %2488 = vmatprep.subr.mxu0 %v2716_v3 }
 0x5c4   :  { %2489 = vmatpush3.msra.mxu0 %v3360_v34 }
 0x5c5   :  { %2490 = vmatprep.subr.mxu0 %v2716_v3 }
 0x5c6   :  { %2491 = vmatpush3.msra.mxu0 %v3367_v35 }
 0x5c7   :  { %2530 = vmatprep.subr.mxu0 %v2716_v3 }
 0x647   :  { %v800_v41 = vpop.f32.mrf.mxu0 }
 0x648   :  { %v804_v42 = vadd.f32 %v800_v41, %v2999_v39 }
 0x649   :  { %v2345_v43 = vpop.f32.mrf.mxu0 }
 0x64a   :  { %v805_v44 = vmax.f32 %v804_v42, 0.0 }
 0x64c   :  { %2388 = vmatmul.mubr.f32.gmra.mxu1 %v805_v44 }
 0x64d   :  { %2457 = vmatprep.mubr.msk.f32.mxu1 %vm2717_vm2, %v2716_v3 }
 0x667   :  { %v1036_v49 = vpop.f32.mrf.mxu0 }
 0x668   :  { %v3451_v50 = vadd.f32 %v1036_v49, %v906_v48 }
 0x669   :  { %v2424_v51 = vpop.f32.mrf.mxu0 }
 0x66a   :  { %v1041_v39 = vmax.f32 %v3451_v50, 0.0 }
 0x66c   :  { %2458 = vmatmul.mubr.f32.vlgmr.msra.gmra.mxu1 %v1041_v39 }
 0x66d   :  { %2496 = vmatpush3.msra.mxu1 %v3263_v20  ;;  %2527 = vmatprep.mubr.msk.f32.mxu1 %vm2717_vm2, %v2716_v3 }
 0x66e   :  { %2497 = vmatprep.subr.mxu1 %v2716_v3 }
 0x66f   :  { %2498 = vmatpush3.msra.mxu1 %v3269_v21 }
 0x670   :  { %2499 = vmatprep.subr.mxu1 %v2716_v3 }
 0x671   :  { %2500 = vmatpush3.msra.mxu1 %v3276_v22 }
 0x672   :  { %2501 = vmatprep.subr.mxu1 %v2716_v3 }
 0x673   :  { %2502 = vmatpush3.msra.mxu1 %v3283_v23 }
 0x674   :  { %2503 = vmatprep.subr.mxu1 %v2716_v3 }
 0x675   :  { %2504 = vmatpush3.msra.mxu1 %v3290_v24 }
 0x676   :  { %2505 = vmatprep.subr.mxu1 %v2716_v3 }
 0x677   :  { %2506 = vmatpush3.msra.mxu1 %v3297_v25 }
 0x678   :  { %2507 = vmatprep.subr.mxu1 %v2716_v3 }
 0x679   :  { %2508 = vmatpush3.msra.mxu1 %v3304_v26 }
 0x67a   :  { %2509 = vmatprep.subr.mxu1 %v2716_v3 }
 0x67b   :  { %2510 = vmatpush3.msra.mxu1 %v3311_v27 }
 0x67c   :  { %2511 = vmatprep.subr.mxu1 %v2716_v3 }
 0x67d   :  { %2512 = vmatpush3.msra.mxu1 %v3318_v28 }
 0x67e   :  { %2513 = vmatprep.subr.mxu1 %v2716_v3 }
 0x67f   :  { %2514 = vmatpush3.msra.mxu1 %v3325_v29 }
 0x680   :  { %2515 = vmatprep.subr.mxu1 %v2716_v3 }
 0x681   :  { %2516 = vmatpush3.msra.mxu1 %v3332_v30 }
 0x682   :  { %2517 = vmatprep.subr.mxu1 %v2716_v3 }
 0x683   :  { %2518 = vmatpush3.msra.mxu1 %v3339_v31 }
 0x684   :  { %2519 = vmatprep.subr.mxu1 %v2716_v3 }
 0x685   :  { %2520 = vmatpush3.msra.mxu1 %v3346_v32 }
 0x686   :  { %2521 = vmatprep.subr.mxu1 %v2716_v3 }
 0x687   :  { %2522 = vmatpush3.msra.mxu1 %v3353_v33 }
 0x688   :  { %2523 = vmatprep.subr.mxu1 %v2716_v3 }
 0x689   :  { %2524 = vmatpush3.msra.mxu1 %v3360_v34 }
 0x68a   :  { %2525 = vmatprep.subr.mxu1 %v2716_v3 }
 0x68b   :  { %2526 = vmatpush3.msra.mxu1 %v3367_v35 }
 0x68c   :  { %2565 = vmatprep.subr.mxu1 %v2716_v3 }
 0x70c   :  { %v3496_v56 = vpop.f32.mrf.mxu1 }
 0x70d   :  { %v941_v55 = vadd.f32 %v3496_v56, %v3448_v47 }
 0x70e   :  { %v3498_v57 = vpop.f32.mrf.mxu1 }
 0x70f   :  { %v936_v36 = vadd.f32 %v3448_v47, %v3498_v57 }
 0x72c   :  { %v1110_v59 = vpop.f32.mrf.mxu1 }
 0x72d   :  { %v3501_v60 = vadd.f32 %v1110_v59, %v911_v58 }
 0x72e   :  { %v2459_v61 = vpop.f32.mrf.mxu1 }
 0x72f   :  { %v1115_v62 = vmax.f32 %v3501_v60, 0.0 }
 0x731   :  { %2493 = vmatmul.mubr.f32.vlgmr.msra.gmra.mxu0 %v1115_v62 }
 0x732   :  { %2531 = vmatpush3.msra.mxu0 %v3263_v20  ;;  %2562 = vmatprep.mubr.msk.f32.mxu0 %vm2717_vm2, %v2716_v3 }
 0x733   :  { %2532 = vmatprep.subr.mxu0 %v2716_v3 }
 0x734   :  { %2533 = vmatpush3.msra.mxu0 %v3269_v21 }
 0x735   :  { %2534 = vmatprep.subr.mxu0 %v2716_v3 }
 0x736   :  { %2535 = vmatpush3.msra.mxu0 %v3276_v22 }
 0x737   :  { %2536 = vmatprep.subr.mxu0 %v2716_v3 }
 0x738   :  { %2537 = vmatpush3.msra.mxu0 %v3283_v23 }
 0x739   :  { %2538 = vmatprep.subr.mxu0 %v2716_v3 }
 0x73a   :  { %2539 = vmatpush3.msra.mxu0 %v3290_v24 }
 0x73b   :  { %2540 = vmatprep.subr.mxu0 %v2716_v3 }
 0x73c   :  { %2541 = vmatpush3.msra.mxu0 %v3297_v25 }
 0x73d   :  { %2542 = vmatprep.subr.mxu0 %v2716_v3 }
 0x73e   :  { %2543 = vmatpush3.msra.mxu0 %v3304_v26 }
 0x73f   :  { %2544 = vmatprep.subr.mxu0 %v2716_v3 }
 0x740   :  { %2545 = vmatpush3.msra.mxu0 %v3311_v27 }
 0x741   :  { %2546 = vmatprep.subr.mxu0 %v2716_v3 }
 0x742   :  { %2547 = vmatpush3.msra.mxu0 %v3318_v28 }
 0x743   :  { %2548 = vmatprep.subr.mxu0 %v2716_v3 }
 0x744   :  { %2549 = vmatpush3.msra.mxu0 %v3325_v29 }
 0x745   :  { %2550 = vmatprep.subr.mxu0 %v2716_v3 }
 0x746   :  { %2551 = vmatpush3.msra.mxu0 %v3332_v30 }
 0x747   :  { %2552 = vmatprep.subr.mxu0 %v2716_v3 }
 0x748   :  { %2553 = vmatpush3.msra.mxu0 %v3339_v31 }
 0x749   :  { %2554 = vmatprep.subr.mxu0 %v2716_v3 }
 0x74a   :  { %2555 = vmatpush3.msra.mxu0 %v3346_v32 }
 0x74b   :  { %2556 = vmatprep.subr.mxu0 %v2716_v3 }
 0x74c   :  { %2557 = vmatpush3.msra.mxu0 %v3353_v33 }
 0x74d   :  { %2558 = vmatprep.subr.mxu0 %v2716_v3 }
 0x74e   :  { %2559 = vmatpush3.msra.mxu0 %v3360_v34 }
 0x74f   :  { %2560 = vmatprep.subr.mxu0 %v2716_v3 }
 0x750   :  { %2561 = vmatpush3.msra.mxu0 %v3367_v35 }
 0x751   :  { %2600 = vmatprep.subr.mxu0 %v2716_v3 }
 0x7f1   :  { %v1184_v0 = vpop.f32.mrf.mxu0 }
 0x7f2   :  { %v3541_v1 = vadd.f32 %v1184_v0, %v916_v63 }
 0x7f3   :  { %v2494_v2 = vpop.f32.mrf.mxu0 }
 0x7f4   :  { %v1189_v4 = vmax.f32 %v3541_v1, 0.0 }
 0x7f6   :  { %2528 = vmatmul.mubr.f32.vlgmr.msra.gmra.mxu1 %v1189_v4 }
 0x7f7   :  { %2566 = vmatpush3.msra.mxu1 %v3263_v20  ;;  %2597 = vmatprep.mubr.msk.f32.mxu1 %vm2717_vm2, %v2716_v3 }
 0x7f8   :  { %2567 = vmatprep.subr.mxu1 %v2716_v3 }
 0x7f9   :  { %2568 = vmatpush3.msra.mxu1 %v3269_v21 }
 0x7fa   :  { %2569 = vmatprep.subr.mxu1 %v2716_v3 }
 0x7fb   :  { %2570 = vmatpush3.msra.mxu1 %v3276_v22 }
 0x7fc   :  { %2571 = vmatprep.subr.mxu1 %v2716_v3 }
 0x7fd   :  { %2572 = vmatpush3.msra.mxu1 %v3283_v23 }
 0x7fe   :  { %2573 = vmatprep.subr.mxu1 %v2716_v3 }
 0x7ff   :  { %2574 = vmatpush3.msra.mxu1 %v3290_v24 }
 0x800   :  { %2575 = vmatprep.subr.mxu1 %v2716_v3 }
 0x801   :  { %2576 = vmatpush3.msra.mxu1 %v3297_v25 }
 0x802   :  { %2577 = vmatprep.subr.mxu1 %v2716_v3 }
 0x803   :  { %2578 = vmatpush3.msra.mxu1 %v3304_v26 }
 0x804   :  { %2579 = vmatprep.subr.mxu1 %v2716_v3 }
 0x805   :  { %2580 = vmatpush3.msra.mxu1 %v3311_v27 }
 0x806   :  { %2581 = vmatprep.subr.mxu1 %v2716_v3 }
 0x807   :  { %2582 = vmatpush3.msra.mxu1 %v3318_v28 }
 0x808   :  { %2583 = vmatprep.subr.mxu1 %v2716_v3 }
 0x809   :  { %2584 = vmatpush3.msra.mxu1 %v3325_v29 }
 0x80a   :  { %2585 = vmatprep.subr.mxu1 %v2716_v3 }
 0x80b   :  { %2586 = vmatpush3.msra.mxu1 %v3332_v30 }
 0x80c   :  { %2587 = vmatprep.subr.mxu1 %v2716_v3 }
 0x80d   :  { %2588 = vmatpush3.msra.mxu1 %v3339_v31 }
 0x80e   :  { %2589 = vmatprep.subr.mxu1 %v2716_v3 }
 0x80f   :  { %2590 = vmatpush3.msra.mxu1 %v3346_v32 }
 0x810   :  { %2591 = vmatprep.subr.mxu1 %v2716_v3 }
 0x811   :  { %2592 = vmatpush3.msra.mxu1 %v3353_v33 }
 0x812   :  { %2593 = vmatprep.subr.mxu1 %v2716_v3 }
 0x813   :  { %2594 = vmatpush3.msra.mxu1 %v3360_v34 }
 0x814   :  { %2595 = vmatprep.subr.mxu1 %v2716_v3 }
 0x815   :  { %2596 = vmatpush3.msra.mxu1 %v3367_v35 }
 0x816   :  { %2635 = vmatprep.subr.mxu1 %v2716_v3 }
 0x8b6   :  { %v1258_v6 = vpop.f32.mrf.mxu1 }
 0x8b7   :  { %v3582_v7 = vadd.f32 %v1258_v6, %v921_v5 }
 0x8b8   :  { %v2529_v8 = vpop.f32.mrf.mxu1 }
 0x8b9   :  { %v1263_v9 = vmax.f32 %v3582_v7, 0.0 }
 0x8bb   :  { %2563 = vmatmul.mubr.f32.vlgmr.msra.gmra.mxu0 %v1263_v9 }
 0x8bc   :  { %2601 = vmatpush3.msra.mxu0 %v3263_v20  ;;  %2632 = vmatprep.mubr.msk.f32.mxu0 %vm2717_vm2, %v2716_v3 }
 0x8bd   :  { %2602 = vmatprep.subr.mxu0 %v2716_v3 }
 0x8be   :  { %2603 = vmatpush3.msra.mxu0 %v3269_v21 }
 0x8bf   :  { %2604 = vmatprep.subr.mxu0 %v2716_v3 }
 0x8c0   :  { %2605 = vmatpush3.msra.mxu0 %v3276_v22 }
 0x8c1   :  { %2606 = vmatprep.subr.mxu0 %v2716_v3 }
 0x8c2   :  { %2607 = vmatpush3.msra.mxu0 %v3283_v23 }
 0x8c3   :  { %2608 = vmatprep.subr.mxu0 %v2716_v3 }
 0x8c4   :  { %2609 = vmatpush3.msra.mxu0 %v3290_v24 }
 0x8c5   :  { %2610 = vmatprep.subr.mxu0 %v2716_v3 }
 0x8c6   :  { %2611 = vmatpush3.msra.mxu0 %v3297_v25 }
 0x8c7   :  { %2612 = vmatprep.subr.mxu0 %v2716_v3 }
 0x8c8   :  { %2613 = vmatpush3.msra.mxu0 %v3304_v26 }
 0x8c9   :  { %2614 = vmatprep.subr.mxu0 %v2716_v3 }
 0x8ca   :  { %2615 = vmatpush3.msra.mxu0 %v3311_v27 }
 0x8cb   :  { %2616 = vmatprep.subr.mxu0 %v2716_v3 }
 0x8cc   :  { %2617 = vmatpush3.msra.mxu0 %v3318_v28 }
 0x8cd   :  { %2618 = vmatprep.subr.mxu0 %v2716_v3 }
 0x8ce   :  { %2619 = vmatpush3.msra.mxu0 %v3325_v29 }
 0x8cf   :  { %2620 = vmatprep.subr.mxu0 %v2716_v3 }
 0x8d0   :  { %2621 = vmatpush3.msra.mxu0 %v3332_v30 }
 0x8d1   :  { %2622 = vmatprep.subr.mxu0 %v2716_v3 }
 0x8d2   :  { %2623 = vmatpush3.msra.mxu0 %v3339_v31 }
 0x8d3   :  { %2624 = vmatprep.subr.mxu0 %v2716_v3 }
 0x8d4   :  { %2625 = vmatpush3.msra.mxu0 %v3346_v32 }
 0x8d5   :  { %2626 = vmatprep.subr.mxu0 %v2716_v3 }
 0x8d6   :  { %2627 = vmatpush3.msra.mxu0 %v3353_v33 }
 0x8d7   :  { %2628 = vmatprep.subr.mxu0 %v2716_v3 }
 0x8d8   :  { %2629 = vmatpush3.msra.mxu0 %v3360_v34 }
 0x8d9   :  { %2630 = vmatprep.subr.mxu0 %v2716_v3 }
 0x8da   :  { %2631 = vmatpush3.msra.mxu0 %v3367_v35 }
 0x8db   :  { %2670 = vmatprep.subr.mxu0 %v1585_v15 }
 0x97b   :  { %v1332_v11 = vpop.f32.mrf.mxu0 }
 0x97c   :  { %v3622_v12 = vadd.f32 %v1332_v11, %v926_v10 }
 0x97d   :  { %v2564_v13 = vpop.f32.mrf.mxu0 }
 0x97e   :  { %v1337_v14 = vmax.f32 %v3622_v12, 0.0 }
 0x980   :  { %2598 = vmatmul.mubr.f32.vlgmr.msra.gmra.mxu1 %v1337_v14 }
 0x981   :  { %2636 = vmatpush3.msra.mxu1 %v3263_v20  ;;  %2667 = vmatprep.mubr.msk.f32.mxu1 %vm2717_vm2, %v2716_v3 }
 0x982   :  { %2637 = vmatprep.subr.mxu1 %v2716_v3 }
 0x983   :  { %2638 = vmatpush3.msra.mxu1 %v3269_v21  ;;  %v1584_v21 = vld [vmem:[%s3766_s7 + $0x70] sm:$0xff] }
 0x984   :  { %2639 = vmatprep.subr.mxu1 %v2716_v3 }
 0x985   :  { %2640 = vmatpush3.msra.mxu1 %v3276_v22  ;;  %v1582_v22 = vld [vmem:[%s3766_s7 + $0x60] sm:$0xff] }
 0x986   :  { %2641 = vmatprep.subr.mxu1 %v2716_v3 }
 0x987   :  { %2642 = vmatpush3.msra.mxu1 %v3283_v23  ;;  %v1581_v23 = vld [vmem:[%s3766_s7 + $0x58] sm:$0xff] }
 0x988   :  { %2643 = vmatprep.subr.mxu1 %v2716_v3 }
 0x989   :  { %2644 = vmatpush3.msra.mxu1 %v3290_v24  ;;  %v1580_v24 = vld [vmem:[%s3766_s7 + $0x50] sm:$0xff] }
 0x98a   :  { %2645 = vmatprep.subr.mxu1 %v2716_v3 }
 0x98b   :  { %2646 = vmatpush3.msra.mxu1 %v3297_v25  ;;  %v1579_v25 = vld [vmem:[%s3766_s7 + $0x48] sm:$0xff] }
 0x98c   :  { %2647 = vmatprep.subr.mxu1 %v2716_v3 }
 0x98d   :  { %2648 = vmatpush3.msra.mxu1 %v3304_v26  ;;  %v1578_v26 = vld [vmem:[%s3766_s7 + $0x40] sm:$0xff] }
 0x98e   :  { %2649 = vmatprep.subr.mxu1 %v2716_v3 }
 0x98f   :  { %2650 = vmatpush3.msra.mxu1 %v3311_v27  ;;  %v1577_v27 = vld [vmem:[%s3766_s7 + $0x38] sm:$0xff] }
 0x990   :  { %2651 = vmatprep.subr.mxu1 %v2716_v3 }
 0x991   :  { %2652 = vmatpush3.msra.mxu1 %v3318_v28  ;;  %v1576_v28 = vld [vmem:[%s3766_s7 + $0x30] sm:$0xff] }
 0x992   :  { %2653 = vmatprep.subr.mxu1 %v2716_v3 }
 0x993   :  { %2654 = vmatpush3.msra.mxu1 %v3325_v29  ;;  %v1575_v29 = vld [vmem:[%s3766_s7 + $0x28] sm:$0xff] }
 0x994   :  { %2655 = vmatprep.subr.mxu1 %v2716_v3 }
 0x995   :  { %2656 = vmatpush3.msra.mxu1 %v3332_v30  ;;  %v1574_v30 = vld [vmem:[%s3766_s7 + $0x20] sm:$0xff] }
 0x996   :  { %2657 = vmatprep.subr.mxu1 %v2716_v3 }
 0x997   :  { %2658 = vmatpush3.msra.mxu1 %v3339_v31  ;;  %v1573_v31 = vld [vmem:[%s3766_s7 + $0x18] sm:$0xff] }
 0x998   :  { %2659 = vmatprep.subr.mxu1 %v2716_v3 }
 0x999   :  { %2660 = vmatpush3.msra.mxu1 %v3346_v32  ;;  %v1572_v32 = vld [vmem:[%s3766_s7 + $0x10] sm:$0xff] }
 0x99a   :  { %2661 = vmatprep.subr.mxu1 %v2716_v3 }
 0x99b   :  { %2662 = vmatpush3.msra.mxu1 %v3353_v33  ;;  %v1571_v33 = vld [vmem:[%s3766_s7 + $0x8] sm:$0xff] }
 0x99c   :  { %2663 = vmatprep.subr.mxu1 %v2716_v3 }
 0x99d   :  { %2664 = vmatpush3.msra.mxu1 %v3360_v34  ;;  %v1570_v34 = vld [vmem:[%s3766_s7] sm:$0xff] }
 0x99e   :  { %2665 = vmatprep.subr.mxu1 %v2716_v3  ;;  %v1583_v3 = vld [vmem:[%s3766_s7 + $0x68] sm:$0xff] }
 0x99f   :  { %2666 = vmatpush3.msra.mxu1 %v3367_v35  ;;  %v14_v35 = vstv %s3767_s8 }
 0x9a0   :  { %15 = vst [vmem:[#allocation5] sm:$0x1] %v14_v35 }
 0x9a7   :  { %v1722_v42 = vld [vmem:[#allocation5] ss:$0 sm:$0xff] }
 0xa40   :  { %v1406_v17 = vpop.f32.mrf.mxu1 }
 0xa41   :  { %v1410_v18 = vadd.f32 %v1406_v17, %v931_v16 }
 0xa42   :  { %v2599_v19 = vpop.f32.mrf.mxu1 }
 0xa43   :  { %v1411_v20 = vmax.f32 %v1410_v18, 0.0 }
 0xa45   :  { %2633 = vmatmul.mubr.f32.vlgmr.msra.gmra.mxu0 %v1411_v20 }
 0xa46   :  { %2671 = vmatpush3.msra.mxu0 %v1585_v15  ;;  %2702 = vmatprep.mubr.f32.mxu0 %v1041_v39 }
 0xa47   :  { %2672 = vmatprep.subr.mxu0 %v1584_v21 }
 0xa48   :  { %2673 = vmatpush3.msra.mxu0 %v1584_v21 }
 0xa49   :  { %2674 = vmatprep.subr.mxu0 %v1583_v3 }
 0xa4a   :  { %2675 = vmatpush3.msra.mxu0 %v1583_v3 }
 0xa4b   :  { %2676 = vmatprep.subr.mxu0 %v1582_v22 }
 0xa4c   :  { %2677 = vmatpush3.msra.mxu0 %v1582_v22 }
 0xa4d   :  { %2678 = vmatprep.subr.mxu0 %v1581_v23 }
 0xa4e   :  { %2679 = vmatpush3.msra.mxu0 %v1581_v23 }
 0xa4f   :  { %2680 = vmatprep.subr.mxu0 %v1580_v24 }
 0xa50   :  { %2681 = vmatpush3.msra.mxu0 %v1580_v24 }
 0xa51   :  { %2682 = vmatprep.subr.mxu0 %v1579_v25 }
 0xa52   :  { %2683 = vmatpush3.msra.mxu0 %v1579_v25 }
 0xa53   :  { %2684 = vmatprep.subr.mxu0 %v1578_v26 }
 0xa54   :  { %2685 = vmatpush3.msra.mxu0 %v1578_v26 }
 0xa55   :  { %2686 = vmatprep.subr.mxu0 %v1577_v27 }
 0xa56   :  { %2687 = vmatpush3.msra.mxu0 %v1577_v27 }
 0xa57   :  { %2688 = vmatprep.subr.mxu0 %v1576_v28 }
 0xa58   :  { %2689 = vmatpush3.msra.mxu0 %v1576_v28 }
 0xa59   :  { %2690 = vmatprep.subr.mxu0 %v1575_v29 }
 0xa5a   :  { %2691 = vmatpush3.msra.mxu0 %v1575_v29 }
 0xa5b   :  { %2692 = vmatprep.subr.mxu0 %v1574_v30 }
 0xa5c   :  { %2693 = vmatpush3.msra.mxu0 %v1574_v30 }
 0xa5d   :  { %2694 = vmatprep.subr.mxu0 %v1573_v31 }
 0xa5e   :  { %2695 = vmatpush3.msra.mxu0 %v1573_v31 }
 0xa5f   :  { %2696 = vmatprep.subr.mxu0 %v1572_v32 }
 0xa60   :  { %2697 = vmatpush3.msra.mxu0 %v1572_v32 }
 0xa61   :  { %2698 = vmatprep.subr.mxu0 %v1571_v33 }
 0xa62   :  { %2699 = vmatpush3.msra.mxu0 %v1571_v33 }
 0xa63   :  { %2700 = vmatprep.subr.mxu0 %v1570_v34 }
 0xa64   :  { %2701 = vmatpush3.msra.mxu0 %v1570_v34 }
 0xa65   :  { %2703 = vmatmul.mubr.f32.vlgmr.msra.gmra.mxu0 %v1115_v62 }
 0xa66   :  { %2705 = vmatprep.mubr.f32.mxu0 %v1189_v4 }
 0xa69   :  { %2706 = vmatmul.mubr.f32.gmra.mxu0 %v1263_v9 }
 0xa6a   :  { %2708 = vmatprep.mubr.f32.mxu0 %v1337_v14 }
 0xa6d   :  { %2709 = vmatmul.mubr.f32.gmra.mxu0 %v1411_v20 }
 0xb05   :  { %v1480_v37 = vpop.f32.mrf.mxu0 }
 0xb06   :  { %v1484_v38 = vadd.f32 %v1480_v37, %v936_v36 }
 0xb07   :  { %v2634_v40 = vpop.f32.mrf.mxu0 }
 0xb08   :  { %v1485_v41 = vmax.f32 %v1484_v38, 0.0 }
 0xb0a   :  { %2668 = vmatmul.mubr.f32.vlgmr.msra.gmra.mxu1 %v1485_v41  ;;  %2711 = vmatprep.mubr.f32.mxu0 %v1485_v41 }
 0xb25   :  { %v2704_v43 = vpop.f32.mrf.mxu0 }
 0xb26   :  { %v1665_v44 = vadd.f32 %v2704_v43, %v1722_v42 }
 0xb27   :  { %v1659_v45 = vpop.f32.mrf.mxu0 }
 0xb28   :  { %1700 = vst.msk [vmem:[%s3768_s9 + $0x8] sm:$0xff] %vm1698_vm3, %v1665_v44  ;;  %v1660_v46 = vadd.f32 %v1722_v42, %v1659_v45 }
 0xb29   :  { %v2707_v48 = vpop.f32.mrf.mxu0 }
 0xb2a   :  { %1699 = vst.msk [vmem:[%s3768_s9] sm:$0xff] %vm1698_vm3, %v1660_v46  ;;  %v1675_v49 = vadd.f32 %v2707_v48, %v1722_v42 }
 0xb2b   :  { %v1669_v50 = vpop.f32.mrf.mxu0 }
 0xb2c   :  { %1702 = vst.msk [vmem:[%s3768_s9 + $0x18] sm:$0xff] %vm1698_vm3, %v1675_v49  ;;  %v1670_v51 = vadd.f32 %v1722_v42, %v1669_v50 }
 0xb2d   :  { %v2710_v39 = vpop.f32.mrf.mxu0 }
 0xb2e   :  { %1701 = vst.msk [vmem:[%s3768_s9 + $0x10] sm:$0xff] %vm1698_vm3, %v1670_v51  ;;  %v1685_v52 = vadd.f32 %v2710_v39, %v1722_v42 }
 0xb2f   :  { %v1679_v53 = vpop.f32.mrf.mxu0 }
 0xb30   :  { %1704 = vst.msk [vmem:[%s3768_s9 + $0x28] sm:$0xff] %vm1698_vm3, %v1685_v52  ;;  %v1680_v54 = vadd.f32 %v1722_v42, %v1679_v53 }
 0xb32   :  { %1703 = vst.msk [vmem:[%s3768_s9 + $0x20] sm:$0xff] %vm1698_vm3, %v1680_v54 }
 0xbca   :  { %v1554_v57 = vpop.f32.mrf.mxu1 }
 0xbcb   :  { %v1558_v58 = vadd.f32 %v1554_v57, %v941_v55 }
 0xbcc   :  { %v2669_v59 = vpop.f32.mrf.mxu1 }
 0xbcd   :  { %v1559_v60 = vmax.f32 %v1558_v58, 0.0 }
 0xbcf   :  { %2712 = vmatmul.mubr.f32.gmra.mxu0 %v1559_v60 }
 0xc8f   :  { %v2713_v61 = vpop.f32.mrf.mxu0 }
 0xc90   :  { %v1695_v62 = vadd.f32 %v2713_v61, %v1722_v42 }
 0xc91   :  { %v1689_v63 = vpop.f32.mrf.mxu0 }
 0xc92   :  { %1706 = vst.msk [vmem:[%s3768_s9 + $0x38] sm:$0xff] %vm1698_vm3, %v1695_v62  ;;  %v1690_v0 = vadd.f32 %v1722_v42, %v1689_v63 }
 0xc94   :  { %1705 = vst.msk [vmem:[%s3768_s9 + $0x30] sm:$0xff] %vm1698_vm3, %v1690_v0 }

</bundles_post_ra>
